<compile_context>
chip_gen: v7x
topology: tpu7x:2x2x1
jax: 0.10.0
libtpu: 0.0.40
codegen_flags: <defaults>
</compile_context>

<pallas_src>
import functools

import jax
import jax.numpy as jnp
from jax import lax
from jax.experimental import pallas as pl
from jax.experimental.pallas import tpu as pltpu

EPS = 1e-5
TM = 512  # rows (of P = N*Ho*Wo) per grid step; multiple of 16 (bf16 packing)


# --------------------------------------------------------------------------
# Pallas kernels (one grid axis over row tiles; no reduction axis)
# --------------------------------------------------------------------------
def _conv_bn_act_kernel(x_ref, w_ref, scale_ref, shift_ref, out_ref, *, relu):
    """out = BN(x @ w) [relu]; BN folded into per-channel scale/shift."""
    y = jnp.dot(x_ref[...], w_ref[...], preferred_element_type=jnp.float32)
    y = y * scale_ref[...] + shift_ref[...]
    if relu:
        y = jnp.maximum(y, 0.0)
    out_ref[...] = y.astype(out_ref.dtype)


def _conv_bn_proj_add_relu_kernel(x2_ref, xs_ref, w2_ref, s2_ref, h2_ref,
                                  ws_ref, ss_ref, hs_ref, out_ref):
    """out = relu(BN2(x2 @ w2) + BNs(xs @ ws)); 1x1 projection shortcut fused."""
    y = jnp.dot(x2_ref[...], w2_ref[...], preferred_element_type=jnp.float32)
    y = y * s2_ref[...] + h2_ref[...]
    r = jnp.dot(xs_ref[...], ws_ref[...], preferred_element_type=jnp.float32)
    r = r * ss_ref[...] + hs_ref[...]
    out_ref[...] = jnp.maximum(y + r, 0.0).astype(out_ref.dtype)


def _conv_bn_add_relu_kernel(x2_ref, res_ref, w2_ref, s2_ref, h2_ref, out_ref):
    """out = relu(BN2(x2 @ w2) + res); identity shortcut."""
    y = jnp.dot(x2_ref[...], w2_ref[...], preferred_element_type=jnp.float32)
    y = y * s2_ref[...] + h2_ref[...] + res_ref[...]
    out_ref[...] = jnp.maximum(y, 0.0).astype(out_ref.dtype)


def _rows_call(kernel, row_args, bcast_args, out_width, tm=TM):
    """Launch `kernel` on a 1-D 'parallel' grid over row tiles.

    row_args:   2-D arrays (P, w_i), tiled as (tm, w_i) blocks along rows.
    bcast_args: small 2-D arrays passed whole to every grid step.
    Returns a (P, out_width) float32 array.
    """
    P = row_args[0].shape[0]
    P_pad = -(-P // tm) * tm
    if P_pad != P:
        row_args = [jnp.pad(a, ((0, P_pad - P), (0, 0))) for a in row_args]

    in_specs = (
        [pl.BlockSpec((tm, a.shape[1]), lambda i: (i, 0)) for a in row_args] +
        [pl.BlockSpec(a.shape, lambda i: (0, 0)) for a in bcast_args])

    out = pl.pallas_call(
        kernel,
        out_shape=jax.ShapeDtypeStruct((P_pad, out_width), jnp.float32),
        grid_spec=pltpu.PrefetchScalarGridSpec(
            num_scalar_prefetch=0,
            grid=(P_pad // tm,),
            in_specs=in_specs,
            out_specs=pl.BlockSpec((tm, out_width), lambda i: (i, 0)),
        ),
        compiler_params=pltpu.CompilerParams(
            dimension_semantics=("parallel",)),
    )(*row_args, *bcast_args)
    return out[:P]


# --------------------------------------------------------------------------
# Glue: im2col, BN folding, ResBlk forward
# --------------------------------------------------------------------------
def _im2col(x_nhwc, k, stride, pad):
    """(N,H,W,C) -> (N*Ho*Wo, k*k*C); K ordered as (ky, kx, c)."""
    N, H, W, C = x_nhwc.shape
    Ho = (H + 2 * pad - k) // stride + 1
    Wo = (W + 2 * pad - k) // stride + 1
    xp = jnp.pad(x_nhwc, ((0, 0), (pad, pad), (pad, pad), (0, 0)))
    taps = []
    for ky in range(k):
        for kx in range(k):
            taps.append(xp[:, ky:ky + (Ho - 1) * stride + 1:stride,
                            kx:kx + (Wo - 1) * stride + 1:stride, :])
    cols = jnp.concatenate(taps, axis=-1)            # (N, Ho, Wo, k*k*C)
    return cols.reshape(N * Ho * Wo, k * k * C), (Ho, Wo)


def _fold_bn(gamma, beta, mean, var, conv_bias):
    scale = gamma / jnp.sqrt(var + EPS)
    shift = beta + scale * (conv_bias - mean)
    return (scale.reshape(1, -1).astype(jnp.float32),
            shift.reshape(1, -1).astype(jnp.float32))


def resblk_forward(x_nchw, p, *, stride):
    """ResBlk.forward. x_nchw: (N, Cin, H, W) -> (N, Cout, Ho, Wo)."""
    x = jnp.transpose(x_nchw, (0, 2, 3, 1)).astype(jnp.float32)      # NHWC
    N, H, W, Cin = x.shape
    Cout = p["w1"].shape[0]
    x_bf = x.astype(jnp.bfloat16)

    # conv1 (3x3, stride, pad=1) + bn1 + relu
    cols1, (Ho, Wo) = _im2col(x_bf, 3, stride, 1)                    # (P, 9*Cin)
    w1 = jnp.transpose(p["w1"], (2, 3, 1, 0)).reshape(9 * Cin, Cout)
    s1, h1 = _fold_bn(p["g1"], p["be1"], p["m1"], p["v1"], p["b1"])
    y1 = _rows_call(functools.partial(_conv_bn_act_kernel, relu=True),
                    [cols1], [w1.astype(jnp.bfloat16), s1, h1], Cout)
    y1_nhwc = y1.reshape(N, Ho, Wo, Cout)

    # conv2 (3x3, stride 1, pad=1) + bn2, fused with shortcut add + relu
    cols2, _ = _im2col(y1_nhwc.astype(jnp.bfloat16), 3, 1, 1)        # (P, 9*Cout)
    w2 = jnp.transpose(p["w2"], (2, 3, 1, 0)).reshape(9 * Cout, Cout)
    s2, h2 = _fold_bn(p["g2"], p["be2"], p["m2"], p["v2"], p["b2"])

    if Cout != Cin:
        # projection shortcut: 1x1 conv (stride) + bn, fused into the same kernel
        cols_sc, _ = _im2col(x_bf, 1, stride, 0)                     # (P, Cin)
        w_sc = jnp.transpose(p["w_sc"], (2, 3, 1, 0)).reshape(Cin, Cout)
        ssc, hsc = _fold_bn(p["g_sc"], p["be_sc"], p["m_sc"], p["v_sc"],
                            p["b_sc"])
        out = _rows_call(_conv_bn_proj_add_relu_kernel,
                         [cols2, cols_sc],
                         [w2.astype(jnp.bfloat16), s2, h2,
                          w_sc.astype(jnp.bfloat16), ssc, hsc], Cout)
    else:
        if stride != 1:
            raise ValueError("identity shortcut requires stride == 1 "
                             "(same constraint as the PyTorch module)")
        res = x.reshape(N * H * W, Cin)                              # f32 residual
        out = _rows_call(_conv_bn_add_relu_kernel,
                         [cols2, res],
                         [w2.astype(jnp.bfloat16), s2, h2], Cout)

    out = out.reshape(N, Ho, Wo, Cout)
    return jnp.transpose(out, (0, 3, 1, 2))                          # back to NCHW


# --------------------------------------------------------------------------
# Pure-JAX reference (mirrors the PyTorch math, eval-mode BN, same bf16
# matmul operands / f32 accumulation as the kernel path)
# --------------------------------------------------------------------------
def resblk_reference(x, p, *, stride):
    def conv(z, w, b, s, pad):
        y = lax.conv_general_dilated(
            z.astype(jnp.bfloat16), w.astype(jnp.bfloat16), (s, s),
            ((pad, pad), (pad, pad)),
            dimension_numbers=("NCHW", "OIHW", "NCHW"),
            preferred_element_type=jnp.float32)
        return y + b[None, :, None, None]

    def bn(z, g, be, m, v):
        return ((z - m[None, :, None, None]) /
                jnp.sqrt(v[None, :, None, None] + EPS) *
                g[None, :, None, None] + be[None, :, None, None])

    out = jax.nn.relu(bn(conv(x, p["w1"], p["b1"], stride, 1),
                         p["g1"], p["be1"], p["m1"], p["v1"]))
    out = bn(conv(out, p["w2"], p["b2"], 1, 1),
             p["g2"], p["be2"], p["m2"], p["v2"])
    cout, cin = p["w1"].shape[0], p["w1"].shape[1]
    if cout != cin:
        sc = bn(conv(x, p["w_sc"], p["b_sc"], stride, 0),
                p["g_sc"], p["be_sc"], p["m_sc"], p["v_sc"])
    else:
        sc = x
    return jax.nn.relu(sc + out)


# --------------------------------------------------------------------------
# Main
# --------------------------------------------------------------------------
if __name__ == "__main__":
    N, Cin, Cout, H, W, STRIDE = 2, 4, 8, 16, 16, 2

    key = jax.random.PRNGKey(0)
    ks = jax.random.split(key, 20)

    def nrm(k, shape, s=0.1):
        return s * jax.random.normal(k, shape, jnp.float32)

    params = {
        # conv1 + bn1
        "w1": nrm(ks[0], (Cout, Cin, 3, 3)),
        "b1": nrm(ks[1], (Cout,)),
        "g1": 1.0 + nrm(ks[2], (Cout,)),
        "be1": nrm(ks[3], (Cout,)),
        "m1": nrm(ks[4], (Cout,)),
        "v1": 0.5 + jnp.abs(nrm(ks[5], (Cout,))),
        # conv2 + bn2
        "w2": nrm(ks[6], (Cout, Cout, 3, 3)),
        "b2": nrm(ks[7], (Cout,)),
        "g2": 1.0 + nrm(ks[8], (Cout,)),
        "be2": nrm(ks[9], (Cout,)),
        "m2": nrm(ks[10], (Cout,)),
        "v2": 0.5 + jnp.abs(nrm(ks[11], (Cout,))),
        # shortcut conv1x1 + bn (ch_out != ch_in)
        "w_sc": nrm(ks[12], (Cout, Cin, 1, 1)),
        "b_sc": nrm(ks[13], (Cout,)),
        "g_sc": 1.0 + nrm(ks[14], (Cout,)),
        "be_sc": nrm(ks[15], (Cout,)),
        "m_sc": nrm(ks[16], (Cout,)),
        "v_sc": 0.5 + jnp.abs(nrm(ks[17], (Cout,))),
    }

    x = jax.random.normal(ks[18], (N, Cin, H, W), jnp.float32)

    fwd = jax.jit(functools.partial(resblk_forward, stride=STRIDE))
    out = jax.block_until_ready(fwd(x, params))

    ref = resblk_reference(x, params, stride=STRIDE)
    assert out.shape == ref.shape, (out.shape, ref.shape)
    assert jnp.allclose(out, ref, atol=5e-3, rtol=5e-3), (
        float(jnp.max(jnp.abs(out - ref))))

    print("KERNEL_OK")
</pallas_src>

<mosaic_0001>
module attributes {stable_mosaic.version = 11 : i64} {
  func.func @_conv_bn_act_kernel(%arg0: i32, %arg1: memref<512x36xbf16, #tpu.memory_space<vmem>>, %arg2: memref<36x8xbf16, #tpu.memory_space<vmem>>, %arg3: memref<1x8xf32, #tpu.memory_space<vmem>>, %arg4: memref<1x8xf32, #tpu.memory_space<vmem>>, %arg5: memref<512x8xf32, #tpu.memory_space<vmem>>) attributes {dimension_semantics = [#tpu.dimension_semantics<parallel>], iteration_bounds = array<i64: 1>, scalar_prefetch = 0 : i64, scratch_operands = 0 : i64, tpu.core_type = #tpu.core_type<tc>, window_params = [{transform_indices = @transform_0, window_bounds = array<i64: 512, 36>}, {pipeline_mode = #tpu.pipeline_mode<synchronous>, transform_indices = @transform_1, window_bounds = array<i64: 36, 8>}, {pipeline_mode = #tpu.pipeline_mode<synchronous>, transform_indices = @transform_2, window_bounds = array<i64: 1, 8>}, {pipeline_mode = #tpu.pipeline_mode<synchronous>, transform_indices = @transform_3, window_bounds = array<i64: 1, 8>}, {transform_indices = @transform_4, window_bounds = array<i64: 512, 8>}]} {
    %c0 = arith.constant 0 : index
    %c0_0 = arith.constant 0 : index
    %0 = vector.load %arg1[%c0, %c0_0] : memref<512x36xbf16, #tpu.memory_space<vmem>>, vector<512x36xbf16>
    %c0_1 = arith.constant 0 : index
    %c0_2 = arith.constant 0 : index
    %1 = vector.load %arg2[%c0_1, %c0_2] : memref<36x8xbf16, #tpu.memory_space<vmem>>, vector<36x8xbf16>
    %cst = arith.constant dense<0.000000e+00> : vector<512x8xf32>
    %2 = tpu.matmul %0, %1, %cst {dimension_numbers = #tpu.dot_dimension_numbers<[1], [0], [0], [1], [0, 0, 1, 1], [], []>} : vector<512x36xbf16>, vector<36x8xbf16>, vector<512x8xf32> -> vector<512x8xf32>
    %c0_3 = arith.constant 0 : index
    %c0_4 = arith.constant 0 : index
    %3 = vector.load %arg3[%c0_3, %c0_4] : memref<1x8xf32, #tpu.memory_space<vmem>>, vector<1x8xf32>
    %4 = vector.broadcast %3 : vector<1x8xf32> to vector<512x8xf32>
    %5 = arith.mulf %2, %4 : vector<512x8xf32>
    %c0_5 = arith.constant 0 : index
    %c0_6 = arith.constant 0 : index
    %6 = vector.load %arg4[%c0_5, %c0_6] : memref<1x8xf32, #tpu.memory_space<vmem>>, vector<1x8xf32>
    %7 = vector.broadcast %6 : vector<1x8xf32> to vector<512x8xf32>
    %8 = arith.addf %5, %7 : vector<512x8xf32>
    %cst_7 = arith.constant 0.000000e+00 : f32
    %9 = vector.broadcast %cst_7 : f32 to vector<512x8xf32>
    %10 = arith.maximumf %8, %9 : vector<512x8xf32>
    %c0_8 = arith.constant 0 : index
    %c0_9 = arith.constant 0 : index
    %11 = vector.load %arg5[%c0_8, %c0_9] : memref<512x8xf32, #tpu.memory_space<vmem>>, vector<512x8xf32>
    tpu.vector_store %arg5[%c0_8, %c0_9], %10 {strides = array<i32>} : memref<512x8xf32, #tpu.memory_space<vmem>>, vector<512x8xf32>,
    return
  }
  func.func @transform_0(%arg0: i32) -> (i32, i32) {
    %c0_i32 = arith.constant 0 : i32
    %c0_i32_0 = arith.constant 0 : i32
    return %arg0, %c0_i32 : i32, i32
  }
  func.func @transform_1(%arg0: i32) -> (i32, i32) {
    %c0_i32 = arith.constant 0 : i32
    %c0_i32_0 = arith.constant 0 : i32
    %c0_i32_1 = arith.constant 0 : i32
    return %c0_i32, %c0_i32_0 : i32, i32
  }
  func.func @transform_2(%arg0: i32) -> (i32, i32) {
    %c0_i32 = arith.constant 0 : i32
    %c0_i32_0 = arith.constant 0 : i32
    %c0_i32_1 = arith.constant 0 : i32
    return %c0_i32, %c0_i32_0 : i32, i32
  }
  func.func @transform_3(%arg0: i32) -> (i32, i32) {
    %c0_i32 = arith.constant 0 : i32
    %c0_i32_0 = arith.constant 0 : i32
    %c0_i32_1 = arith.constant 0 : i32
    return %c0_i32, %c0_i32_0 : i32, i32
  }
  func.func @transform_4(%arg0: i32) -> (i32, i32) {
    %c0_i32 = arith.constant 0 : i32
    %c0_i32_0 = arith.constant 0 : i32
    return %arg0, %c0_i32 : i32, i32
  }
}

module attributes {stable_mosaic.version = 11 : i64} {
  func.func @_conv_bn_proj_add_relu_kernel(%arg0: i32, %arg1: memref<512x72xbf16, #tpu.memory_space<vmem>>, %arg2: memref<512x4xbf16, #tpu.memory_space<vmem>>, %arg3: memref<72x8xbf16, #tpu.memory_space<vmem>>, %arg4: memref<1x8xf32, #tpu.memory_space<vmem>>, %arg5: memref<1x8xf32, #tpu.memory_space<vmem>>, %arg6: memref<4x8xbf16, #tpu.memory_space<vmem>>, %arg7: memref<1x8xf32, #tpu.memory_space<vmem>>, %arg8: memref<1x8xf32, #tpu.memory_space<vmem>>, %arg9: memref<512x8xf32, #tpu.memory_space<vmem>>) attributes {dimension_semantics = [#tpu.dimension_semantics<parallel>], iteration_bounds = array<i64: 1>, scalar_prefetch = 0 : i64, scratch_operands = 0 : i64, tpu.core_type = #tpu.core_type<tc>, window_params = [{transform_indices = @transform_0, window_bounds = array<i64: 512, 72>}, {transform_indices = @transform_1, window_bounds = array<i64: 512, 4>}, {pipeline_mode = #tpu.pipeline_mode<synchronous>, transform_indices = @transform_2, window_bounds = array<i64: 72, 8>}, {pipeline_mode = #tpu.pipeline_mode<synchronous>, transform_indices = @transform_3, window_bounds = array<i64: 1, 8>}, {pipeline_mode = #tpu.pipeline_mode<synchronous>, transform_indices = @transform_4, window_bounds = array<i64: 1, 8>}, {pipeline_mode = #tpu.pipeline_mode<synchronous>, transform_indices = @transform_5, window_bounds = array<i64: 4, 8>}, {pipeline_mode = #tpu.pipeline_mode<synchronous>, transform_indices = @transform_6, window_bounds = array<i64: 1, 8>}, {pipeline_mode = #tpu.pipeline_mode<synchronous>, transform_indices = @transform_7, window_bounds = array<i64: 1, 8>}, {transform_indices = @transform_8, window_bounds = array<i64: 512, 8>}]} {
    %c0 = arith.constant 0 : index
    %c0_0 = arith.constant 0 : index
    %0 = vector.load %arg1[%c0, %c0_0] : memref<512x72xbf16, #tpu.memory_space<vmem>>, vector<512x72xbf16>
    %c0_1 = arith.constant 0 : index
    %c0_2 = arith.constant 0 : index
    %1 = vector.load %arg3[%c0_1, %c0_2] : memref<72x8xbf16, #tpu.memory_space<vmem>>, vector<72x8xbf16>
    %cst = arith.constant dense<0.000000e+00> : vector<512x8xf32>
    %2 = tpu.matmul %0, %1, %cst {dimension_numbers = #tpu.dot_dimension_numbers<[1], [0], [0], [1], [0, 0, 1, 1], [], []>} : vector<512x72xbf16>, vector<72x8xbf16>, vector<512x8xf32> -> vector<512x8xf32>
    %c0_3 = arith.constant 0 : index
    %c0_4 = arith.constant 0 : index
    %3 = vector.load %arg4[%c0_3, %c0_4] : memref<1x8xf32, #tpu.memory_space<vmem>>, vector<1x8xf32>
    %4 = vector.broadcast %3 : vector<1x8xf32> to vector<512x8xf32>
    %5 = arith.mulf %2, %4 : vector<512x8xf32>
    %c0_5 = arith.constant 0 : index
    %c0_6 = arith.constant 0 : index
    %6 = vector.load %arg5[%c0_5, %c0_6] : memref<1x8xf32, #tpu.memory_space<vmem>>, vector<1x8xf32>
    %7 = vector.broadcast %6 : vector<1x8xf32> to vector<512x8xf32>
    %8 = arith.addf %5, %7 : vector<512x8xf32>
    %c0_7 = arith.constant 0 : index
    %c0_8 = arith.constant 0 : index
    %9 = vector.load %arg2[%c0_7, %c0_8] : memref<512x4xbf16, #tpu.memory_space<vmem>>, vector<512x4xbf16>
    %c0_9 = arith.constant 0 : index
    %c0_10 = arith.constant 0 : index
    %10 = vector.load %arg6[%c0_9, %c0_10] : memref<4x8xbf16, #tpu.memory_space<vmem>>, vector<4x8xbf16>
    %cst_11 = arith.constant dense<0.000000e+00> : vector<512x8xf32>
    %11 = tpu.matmul %9, %10, %cst_11 {dimension_numbers = #tpu.dot_dimension_numbers<[1], [0], [0], [1], [0, 0, 1, 1], [], []>} : vector<512x4xbf16>, vector<4x8xbf16>, vector<512x8xf32> -> vector<512x8xf32>
    %c0_12 = arith.constant 0 : index
    %c0_13 = arith.constant 0 : index
    %12 = vector.load %arg7[%c0_12, %c0_13] : memref<1x8xf32, #tpu.memory_space<vmem>>, vector<1x8xf32>
    %13 = vector.broadcast %12 : vector<1x8xf32> to vector<512x8xf32>
    %14 = arith.mulf %11, %13 : vector<512x8xf32>
    %c0_14 = arith.constant 0 : index
    %c0_15 = arith.constant 0 : index
    %15 = vector.load %arg8[%c0_14, %c0_15] : memref<1x8xf32, #tpu.memory_space<vmem>>, vector<1x8xf32>
    %16 = vector.broadcast %15 : vector<1x8xf32> to vector<512x8xf32>
    %17 = arith.addf %14, %16 : vector<512x8xf32>
    %18 = arith.addf %8, %17 : vector<512x8xf32>
    %cst_16 = arith.constant 0.000000e+00 : f32
    %19 = vector.broadcast %cst_16 : f32 to vector<512x8xf32>
    %20 = arith.maximumf %18, %19 : vector<512x8xf32>
    %c0_17 = arith.constant 0 : index
    %c0_18 = arith.constant 0 : index
    %21 = vector.load %arg9[%c0_17, %c0_18] : memref<512x8xf32, #tpu.memory_space<vmem>>, vector<512x8xf32>
    tpu.vector_store %arg9[%c0_17, %c0_18], %20 {strides = array<i32>} : memref<512x8xf32, #tpu.memory_space<vmem>>, vector<512x8xf32>,
    return
  }
  func.func @transform_0(%arg0: i32) -> (i32, i32) {
    %c0_i32 = arith.constant 0 : i32
    %c0_i32_0 = arith.constant 0 : i32
    return %arg0, %c0_i32 : i32, i32
  }
  func.func @transform_1(%arg0: i32) -> (i32, i32) {
    %c0_i32 = arith.constant 0 : i32
    %c0_i32_0 = arith.constant 0 : i32
    return %arg0, %c0_i32 : i32, i32
  }
  func.func @transform_2(%arg0: i32) -> (i32, i32) {
    %c0_i32 = arith.constant 0 : i32
    %c0_i32_0 = arith.constant 0 : i32
    %c0_i32_1 = arith.constant 0 : i32
    return %c0_i32, %c0_i32_0 : i32, i32
  }
  func.func @transform_3(%arg0: i32) -> (i32, i32) {
    %c0_i32 = arith.constant 0 : i32
    %c0_i32_0 = arith.constant 0 : i32
    %c0_i32_1 = arith.constant 0 : i32
    return %c0_i32, %c0_i32_0 : i32, i32
  }
  func.func @transform_4(%arg0: i32) -> (i32, i32) {
    %c0_i32 = arith.constant 0 : i32
    %c0_i32_0 = arith.constant 0 : i32
    %c0_i32_1 = arith.constant 0 : i32
    return %c0_i32, %c0_i32_0 : i32, i32
  }
  func.func @transform_5(%arg0: i32) -> (i32, i32) {
    %c0_i32 = arith.constant 0 : i32
    %c0_i32_0 = arith.constant 0 : i32
    %c0_i32_1 = arith.constant 0 : i32
    return %c0_i32, %c0_i32_0 : i32, i32
  }
  func.func @transform_6(%arg0: i32) -> (i32, i32) {
    %c0_i32 = arith.constant 0 : i32
    %c0_i32_0 = arith.constant 0 : i32
    %c0_i32_1 = arith.constant 0 : i32
    return %c0_i32, %c0_i32_0 : i32, i32
  }
  func.func @transform_7(%arg0: i32) -> (i32, i32) {
    %c0_i32 = arith.constant 0 : i32
    %c0_i32_0 = arith.constant 0 : i32
    %c0_i32_1 = arith.constant 0 : i32
    return %c0_i32, %c0_i32_0 : i32, i32
  }
  func.func @transform_8(%arg0: i32) -> (i32, i32) {
    %c0_i32 = arith.constant 0 : i32
    %c0_i32_0 = arith.constant 0 : i32
    return %arg0, %c0_i32 : i32, i32
  }
}

</mosaic_0001>

<bundles_post_ra>
// kernel: resblk_forward.2
= control target key start
LH: loop header
LB: loop body
LE: loop exit
PB: predicated region body
PF: predicated region fallthrough
CT: control target
= control target key end

     0   :  { %vm262_vm0 = vcmask 293888   ;;  %vm359_vm1 = vcmask 1041408   ;;  %vm858_vm2 = vcmask 64512   ;;  %s1700_s1 = inlined_call_operand.vmem [shape: bf16[36,8], index: 1, kind: input, shape index: {}]   ;;  %s1701_s0 = inlined_call_operand.vmem [shape: bf16[512,36], index: 0, kind: input, shape index: {}]   ;;  %s1702_s2 = inlined_call_operand.vmem [shape: f32[1,8], index: 2, kind: input, shape index: {}]   ;;  %s1703_s3 = inlined_call_operand.vmem [shape: f32[1,8], index: 3, kind: input, shape index: {}]   ;;  %s1704_s4 = inlined_call_operand.vmem [shape: f32[512,8], index: 4, kind: output, shape index: {}]  }
   0x1   :  { %v1109_v0 = vld [vmem:[%s1700_s1] sm:$0xff]   ;;  %v1110_v1 = vld [vmem:[%s1700_s1 + $0x8] sm:$0xff]   ;;  %v1111_v2 = vld [vmem:[%s1700_s1 + $0x10] ss:$0 sps:$4 sm:$0x33]  }
   0x2   :  { %1031 = vmatprep.subr.bf16.mxu0 %v1109_v0  ;;  %1101 = vmatprep.subr.bf16.mxu1 %v1109_v0  ;;  %v1112_v3 = vld [vmem:[%s1701_s0] sm:$0xff]   ;;  %v361_v5 = vsel %vm359_vm1, %v1111_v2, 0  ;;  %v1114_v6 = vld [vmem:[%s1701_s0 + $0x8] sm:$0xff]   ;;  %v1116_v8 = vld [vmem:[%s1701_s0 + $0x10] sm:$0xff]  }
   0x3   :  { %1032 = vmatpush3.bf16.msra.mxu0 %v1109_v0  ;;  %1104 = vmatpush3.bf16.msra.mxu1 %v1109_v0  ;;  %v1113_v4 = vld [vmem:[%s1701_s0 + $0x80] sm:$0xff]   ;;  %v1115_v7 = vld [vmem:[%s1701_s0 + $0x88] sm:$0xff]   ;;  %v1117_v9 = vld [vmem:[%s1701_s0 + $0x90] sm:$0xff]  }
   0x4   :  { %1033 = vmatprep.subr.bf16.mxu0 %v1110_v1  ;;  %1102 = vmatprep.subr.bf16.mxu1 %v1110_v1  ;;  %v1118_v10 = vld [vmem:[%s1701_s0 + $0x18] sm:$0xff]   ;;  %v1120_v12 = vld [vmem:[%s1701_s0 + $0x20] sm:$0xff]   ;;  %v1122_v14 = vld [vmem:[%s1701_s0 + $0x28] sm:$0xff]  }
   0x5   :  { %1037 = vmatprep.mubr.msk.bf16.mxu0 %vm262_vm0, %v1112_v3  ;;  %1069 = vmatprep.mubr.msk.bf16.mxu1 %vm262_vm0, %v1113_v4  ;;  %v1119_v11 = vld [vmem:[%s1701_s0 + $0x98] sm:$0xff]   ;;  %v1121_v13 = vld [vmem:[%s1701_s0 + $0xa0] sm:$0xff]   ;;  %v1123_v15 = vld [vmem:[%s1701_s0 + $0xa8] sm:$0xff]  }
   0x6   :  { %v1124_v16 = vld [vmem:[%s1701_s0 + $0x30] sm:$0xff]   ;;  %v1126_v18 = vld [vmem:[%s1701_s0 + $0x38] sm:$0xff]   ;;  %v1128_v20 = vld [vmem:[%s1701_s0 + $0x40] sm:$0xff]  }
   0x7   :  { %1034 = vmatpush3.bf16.msra.mxu0 %v1110_v1  ;;  %1105 = vmatpush3.bf16.msra.mxu1 %v1110_v1  ;;  %v1125_v17 = vld [vmem:[%s1701_s0 + $0xb0] sm:$0xff]   ;;  %v1127_v19 = vld [vmem:[%s1701_s0 + $0xb8] sm:$0xff]   ;;  %v1129_v21 = vld [vmem:[%s1701_s0 + $0xc0] sm:$0xff]  }
   0x8   :  { %1107 = vmatprep.subr.msk.bf16.mxu0 %vm359_vm1, %v1111_v2  ;;  %1108 = vmatprep.subr.msk.bf16.mxu1 %vm359_vm1, %v1111_v2  ;;  %v1130_v22 = vld [vmem:[%s1701_s0 + $0x48] sm:$0xff]   ;;  %v1132_v24 = vld [vmem:[%s1701_s0 + $0x50] sm:$0xff]   ;;  %v1134_v26 = vld [vmem:[%s1701_s0 + $0x58] sm:$0xff]  }
   0x9   :  { %v1131_v23 = vld [vmem:[%s1701_s0 + $0xc8] sm:$0xff]   ;;  %v1133_v25 = vld [vmem:[%s1701_s0 + $0xd0] sm:$0xff]   ;;  %v1135_v27 = vld [vmem:[%s1701_s0 + $0xd8] sm:$0xff]  }
   0xa   :  { %v1136_v28 = vld [vmem:[%s1701_s0 + $0x60] sm:$0xff]   ;;  %v1138_v30 = vld [vmem:[%s1701_s0 + $0x68] sm:$0xff]   ;;  %v1140_v32 = vld [vmem:[%s1701_s0 + $0x70] sm:$0xff]  }
   0xb   :  { %1036 = vmatpush3.bf16.msra.mxu0 %v361_v5  ;;  %1106 = vmatpush3.bf16.msra.mxu1 %v361_v5  ;;  %v1137_v29 = vld [vmem:[%s1701_s0 + $0xe0] sm:$0xff]   ;;  %v1139_v31 = vld [vmem:[%s1701_s0 + $0xe8] sm:$0xff]   ;;  %v1141_v33 = vld [vmem:[%s1701_s0 + $0xf0] sm:$0xff]  }
   0xc   :  { %v1142_v34 = vld [vmem:[%s1701_s0 + $0x78] sm:$0xff]   ;;  %v1309_v36 = vld [vmem:[%s1702_s2] ss:$0 sm:$0xff] }
   0xd   :  { %v1143_v35 = vld [vmem:[%s1701_s0 + $0xf8] sm:$0xff]   ;;  %v1314_v38 = vld [vmem:[%s1703_s3] ss:$0 sm:$0xff] }
   0xe   :  { %1038 = vmatmul.mubr.msk.bf16.vlgmr.msra.gmra.mrb[0].mxu0 %vm262_vm0, %v1114_v6  ;;  %1070 = vmatmul.mubr.msk.bf16.vlgmr.msra.gmra.mrb[0].mxu1 %vm262_vm0, %v1115_v7 }
   0xf   :  { %1041 = vmatprep.mubr.msk.bf16.mxu0 %vm262_vm0, %v1116_v8  ;;  %1073 = vmatprep.mubr.msk.bf16.mxu1 %vm262_vm0, %v1117_v9 }
  0x16   :  { %1042 = vmatmul.mubr.msk.bf16.gmra.mrb[4].mxu0 %vm262_vm0, %v1118_v10  ;;  %1074 = vmatmul.mubr.msk.bf16.gmra.mrb[4].mxu1 %vm262_vm0, %v1119_v11 }
  0x17   :  { %1045 = vmatprep.mubr.msk.bf16.mxu0 %vm262_vm0, %v1120_v12  ;;  %1077 = vmatprep.mubr.msk.bf16.mxu1 %vm262_vm0, %v1121_v13 }
  0x1e   :  { %1046 = vmatmul.mubr.msk.bf16.gmra.mrb[8].mxu0 %vm262_vm0, %v1122_v14  ;;  %1078 = vmatmul.mubr.msk.bf16.gmra.mrb[8].mxu1 %vm262_vm0, %v1123_v15 }
  0x1f   :  { %1049 = vmatprep.mubr.msk.bf16.mxu0 %vm262_vm0, %v1124_v16  ;;  %1081 = vmatprep.mubr.msk.bf16.mxu1 %vm262_vm0, %v1125_v17 }
  0x26   :  { %1050 = vmatmul.mubr.msk.bf16.gmra.mrb[12].mxu0 %vm262_vm0, %v1126_v18  ;;  %1082 = vmatmul.mubr.msk.bf16.gmra.mrb[12].mxu1 %vm262_vm0, %v1127_v19 }
  0x27   :  { %1053 = vmatprep.mubr.msk.bf16.mxu0 %vm262_vm0, %v1128_v20  ;;  %1085 = vmatprep.mubr.msk.bf16.mxu1 %vm262_vm0, %v1129_v21 }
  0x2e   :  { %1054 = vmatmul.mubr.msk.bf16.gmra.mrb[16].mxu0 %vm262_vm0, %v1130_v22  ;;  %1086 = vmatmul.mubr.msk.bf16.gmra.mrb[16].mxu1 %vm262_vm0, %v1131_v23 }
  0x2f   :  { %1057 = vmatprep.mubr.msk.bf16.mxu0 %vm262_vm0, %v1132_v24  ;;  %1089 = vmatprep.mubr.msk.bf16.mxu1 %vm262_vm0, %v1133_v25 }
  0x36   :  { %1058 = vmatmul.mubr.msk.bf16.gmra.mrb[20].mxu0 %vm262_vm0, %v1134_v26  ;;  %1090 = vmatmul.mubr.msk.bf16.gmra.mrb[20].mxu1 %vm262_vm0, %v1135_v27 }
  0x37   :  { %1061 = vmatprep.mubr.msk.bf16.mxu0 %vm262_vm0, %v1136_v28  ;;  %1093 = vmatprep.mubr.msk.bf16.mxu1 %vm262_vm0, %v1137_v29 }
  0x3e   :  { %1062 = vmatmul.mubr.msk.bf16.gmra.mrb[24].mxu0 %vm262_vm0, %v1138_v30  ;;  %1094 = vmatmul.mubr.msk.bf16.gmra.mrb[24].mxu1 %vm262_vm0, %v1139_v31 }
  0x3f   :  { %1065 = vmatprep.mubr.msk.bf16.mxu0 %vm262_vm0, %v1140_v32  ;;  %1097 = vmatprep.mubr.msk.bf16.mxu1 %vm262_vm0, %v1141_v33 }
  0x46   :  { %1066 = vmatmul.mubr.msk.bf16.gmra.mrb[28].mxu0 %vm262_vm0, %v1142_v34  ;;  %1098 = vmatmul.mubr.msk.bf16.gmra.mrb[28].mxu1 %vm262_vm0, %v1143_v35 }
  0xe1   :  { %v1039_v37 = vpop.f32.mrb[0].mxu0  ;;  %v1071_v39 = vpop.f32.mrb[0].mxu1 }
  0xe2   :  { %v661_v40 = vmul.f32 %v1039_v37, %v1309_v36  ;;  %v693_v41 = vmul.f32 %v1071_v39, %v1309_v36  ;;  %v397_v42 = vpop.f32.mrb[1].mxu0  ;;  %v525_v43 = vpop.f32.mrb[1].mxu1 }
  0xe3   :  { %v659_v44 = vmul.f32 %v1309_v36, %v397_v42  ;;  %v691_v45 = vmul.f32 %v1309_v36, %v525_v43  ;;  %v1040_v46 = vpop.f32.mrb[2].mxu0  ;;  %v1072_v47 = vpop.f32.mrb[2].mxu1 }
  0xe4   :  { %v732_v48 = vadd.f32 %v1314_v38, %v661_v40  ;;  %v764_v49 = vadd.f32 %v1314_v38, %v693_v41  ;;  %v662_v50 = vmul.f32 %v1040_v46, %v1309_v36  ;;  %v694_v51 = vmul.f32 %v1072_v47, %v1309_v36  ;;  %v400_v52 = vpop.f32.mrb[3].mxu0  ;;  %v528_v53 = vpop.f32.mrb[3].mxu1 }
  0xe5   :  { %v730_v54 = vadd.f32 %v1314_v38, %v659_v44  ;;  %v762_v55 = vadd.f32 %v1314_v38, %v691_v45  ;;  %v660_v56 = vmul.f32 %v1309_v36, %v400_v52  ;;  %v692_v57 = vmul.f32 %v1309_v36, %v528_v53 }
  0xe6   :  { %v796_v58 = vmax.f32 %v732_v48, 0.0  ;;  %v828_v59 = vmax.f32 %v764_v49, 0.0  ;;  %v733_v60 = vadd.f32 %v1314_v38, %v662_v50  ;;  %v765_v61 = vadd.f32 %v1314_v38, %v694_v51 }
  0xe7   :  { %v794_v62 = vmax.f32 %v730_v54, 0.0  ;;  %v826_v63 = vmax.f32 %v762_v55, 0.0  ;;  %v731_v0 = vadd.f32 %v1314_v38, %v660_v56  ;;  %v763_v1 = vadd.f32 %v1314_v38, %v692_v57 }
  0xe8   :  { %861 = vst.msk [vmem:[%s1704_s4 + $0x10] sm:$0xff] %vm858_vm2, %v796_v58  ;;  %893 = vst.msk [vmem:[%s1704_s4 + $0x110] sm:$0xff] %vm858_vm2, %v828_v59  ;;  %v797_v2 = vmax.f32 %v733_v60, 0.0  ;;  %v829_v3 = vmax.f32 %v765_v61, 0.0 }
  0xe9   :  { %859 = vst.msk [vmem:[%s1704_s4] sm:$0xff] %vm858_vm2, %v794_v62  ;;  %891 = vst.msk [vmem:[%s1704_s4 + $0x100] sm:$0xff] %vm858_vm2, %v826_v63  ;;  %v795_v4 = vmax.f32 %v731_v0, 0.0  ;;  %v827_v5 = vmax.f32 %v763_v1, 0.0  ;;  %v1043_v6 = vpop.f32.mrb[4].mxu0  ;;  %v1075_v7 = vpop.f32.mrb[4].mxu1 }
  0xea   :  { %862 = vst.msk [vmem:[%s1704_s4 + $0x18] sm:$0xff] %vm858_vm2, %v797_v2  ;;  %894 = vst.msk [vmem:[%s1704_s4 + $0x118] sm:$0xff] %vm858_vm2, %v829_v3  ;;  %v665_v8 = vmul.f32 %v1043_v6, %v1309_v36  ;;  %v697_v9 = vmul.f32 %v1075_v7, %v1309_v36  ;;  %v413_v10 = vpop.f32.mrb[5].mxu0  ;;  %v541_v11 = vpop.f32.mrb[5].mxu1 }
  0xeb   :  { %860 = vst.msk [vmem:[%s1704_s4 + $0x8] sm:$0xff] %vm858_vm2, %v795_v4  ;;  %892 = vst.msk [vmem:[%s1704_s4 + $0x108] sm:$0xff] %vm858_vm2, %v827_v5  ;;  %v663_v12 = vmul.f32 %v1309_v36, %v413_v10  ;;  %v695_v13 = vmul.f32 %v1309_v36, %v541_v11  ;;  %v1044_v14 = vpop.f32.mrb[6].mxu0  ;;  %v1076_v15 = vpop.f32.mrb[6].mxu1 }
  0xec   :  { %v736_v16 = vadd.f32 %v1314_v38, %v665_v8  ;;  %v768_v17 = vadd.f32 %v1314_v38, %v697_v9  ;;  %v666_v18 = vmul.f32 %v1044_v14, %v1309_v36  ;;  %v698_v19 = vmul.f32 %v1076_v15, %v1309_v36  ;;  %v416_v20 = vpop.f32.mrb[7].mxu0  ;;  %v544_v21 = vpop.f32.mrb[7].mxu1 }
  0xed   :  { %v734_v22 = vadd.f32 %v1314_v38, %v663_v12  ;;  %v766_v23 = vadd.f32 %v1314_v38, %v695_v13  ;;  %v664_v24 = vmul.f32 %v1309_v36, %v416_v20  ;;  %v696_v25 = vmul.f32 %v1309_v36, %v544_v21 }
  0xee   :  { %v800_v26 = vmax.f32 %v736_v16, 0.0  ;;  %v832_v27 = vmax.f32 %v768_v17, 0.0  ;;  %v737_v28 = vadd.f32 %v1314_v38, %v666_v18  ;;  %v769_v29 = vadd.f32 %v1314_v38, %v698_v19 }
  0xef   :  { %v798_v30 = vmax.f32 %v734_v22, 0.0  ;;  %v830_v31 = vmax.f32 %v766_v23, 0.0  ;;  %v735_v32 = vadd.f32 %v1314_v38, %v664_v24  ;;  %v767_v33 = vadd.f32 %v1314_v38, %v696_v25 }
  0xf0   :  { %865 = vst.msk [vmem:[%s1704_s4 + $0x30] sm:$0xff] %vm858_vm2, %v800_v26  ;;  %897 = vst.msk [vmem:[%s1704_s4 + $0x130] sm:$0xff] %vm858_vm2, %v832_v27  ;;  %v801_v34 = vmax.f32 %v737_v28, 0.0  ;;  %v833_v35 = vmax.f32 %v769_v29, 0.0 }
  0xf1   :  { %863 = vst.msk [vmem:[%s1704_s4 + $0x20] sm:$0xff] %vm858_vm2, %v798_v30  ;;  %895 = vst.msk [vmem:[%s1704_s4 + $0x120] sm:$0xff] %vm858_vm2, %v830_v31  ;;  %v799_v37 = vmax.f32 %v735_v32, 0.0  ;;  %v831_v39 = vmax.f32 %v767_v33, 0.0  ;;  %v1047_v40 = vpop.f32.mrb[8].mxu0  ;;  %v1079_v41 = vpop.f32.mrb[8].mxu1 }
  0xf2   :  { %866 = vst.msk [vmem:[%s1704_s4 + $0x38] sm:$0xff] %vm858_vm2, %v801_v34  ;;  %898 = vst.msk [vmem:[%s1704_s4 + $0x138] sm:$0xff] %vm858_vm2, %v833_v35  ;;  %v669_v42 = vmul.f32 %v1047_v40, %v1309_v36  ;;  %v701_v43 = vmul.f32 %v1079_v41, %v1309_v36  ;;  %v429_v44 = vpop.f32.mrb[9].mxu0  ;;  %v557_v45 = vpop.f32.mrb[9].mxu1 }
  0xf3   :  { %864 = vst.msk [vmem:[%s1704_s4 + $0x28] sm:$0xff] %vm858_vm2, %v799_v37  ;;  %896 = vst.msk [vmem:[%s1704_s4 + $0x128] sm:$0xff] %vm858_vm2, %v831_v39  ;;  %v667_v46 = vmul.f32 %v1309_v36, %v429_v44  ;;  %v699_v47 = vmul.f32 %v1309_v36, %v557_v45  ;;  %v1048_v48 = vpop.f32.mrb[10].mxu0  ;;  %v1080_v49 = vpop.f32.mrb[10].mxu1 }
  0xf4   :  { %v740_v50 = vadd.f32 %v1314_v38, %v669_v42  ;;  %v772_v51 = vadd.f32 %v1314_v38, %v701_v43  ;;  %v670_v52 = vmul.f32 %v1048_v48, %v1309_v36  ;;  %v702_v53 = vmul.f32 %v1080_v49, %v1309_v36  ;;  %v432_v54 = vpop.f32.mrb[11].mxu0  ;;  %v560_v55 = vpop.f32.mrb[11].mxu1 }
  0xf5   :  { %v738_v56 = vadd.f32 %v1314_v38, %v667_v46  ;;  %v770_v57 = vadd.f32 %v1314_v38, %v699_v47  ;;  %v668_v58 = vmul.f32 %v1309_v36, %v432_v54  ;;  %v700_v59 = vmul.f32 %v1309_v36, %v560_v55 }
  0xf6   :  { %v804_v60 = vmax.f32 %v740_v50, 0.0  ;;  %v836_v61 = vmax.f32 %v772_v51, 0.0  ;;  %v741_v62 = vadd.f32 %v1314_v38, %v670_v52  ;;  %v773_v63 = vadd.f32 %v1314_v38, %v702_v53 }
  0xf7   :  { %v802_v0 = vmax.f32 %v738_v56, 0.0  ;;  %v834_v1 = vmax.f32 %v770_v57, 0.0  ;;  %v739_v2 = vadd.f32 %v1314_v38, %v668_v58  ;;  %v771_v3 = vadd.f32 %v1314_v38, %v700_v59 }
  0xf8   :  { %869 = vst.msk [vmem:[%s1704_s4 + $0x50] sm:$0xff] %vm858_vm2, %v804_v60  ;;  %901 = vst.msk [vmem:[%s1704_s4 + $0x150] sm:$0xff] %vm858_vm2, %v836_v61  ;;  %v805_v4 = vmax.f32 %v741_v62, 0.0  ;;  %v837_v5 = vmax.f32 %v773_v63, 0.0 }
  0xf9   :  { %867 = vst.msk [vmem:[%s1704_s4 + $0x40] sm:$0xff] %vm858_vm2, %v802_v0  ;;  %899 = vst.msk [vmem:[%s1704_s4 + $0x140] sm:$0xff] %vm858_vm2, %v834_v1  ;;  %v803_v6 = vmax.f32 %v739_v2, 0.0  ;;  %v835_v7 = vmax.f32 %v771_v3, 0.0  ;;  %v1051_v8 = vpop.f32.mrb[12].mxu0  ;;  %v1083_v9 = vpop.f32.mrb[12].mxu1 }
  0xfa   :  { %870 = vst.msk [vmem:[%s1704_s4 + $0x58] sm:$0xff] %vm858_vm2, %v805_v4  ;;  %902 = vst.msk [vmem:[%s1704_s4 + $0x158] sm:$0xff] %vm858_vm2, %v837_v5  ;;  %v673_v10 = vmul.f32 %v1051_v8, %v1309_v36  ;;  %v705_v11 = vmul.f32 %v1083_v9, %v1309_v36  ;;  %v445_v12 = vpop.f32.mrb[13].mxu0  ;;  %v573_v13 = vpop.f32.mrb[13].mxu1 }
  0xfb   :  { %868 = vst.msk [vmem:[%s1704_s4 + $0x48] sm:$0xff] %vm858_vm2, %v803_v6  ;;  %900 = vst.msk [vmem:[%s1704_s4 + $0x148] sm:$0xff] %vm858_vm2, %v835_v7  ;;  %v671_v14 = vmul.f32 %v1309_v36, %v445_v12  ;;  %v703_v15 = vmul.f32 %v1309_v36, %v573_v13  ;;  %v1052_v16 = vpop.f32.mrb[14].mxu0  ;;  %v1084_v17 = vpop.f32.mrb[14].mxu1 }
  0xfc   :  { %v744_v18 = vadd.f32 %v1314_v38, %v673_v10  ;;  %v776_v19 = vadd.f32 %v1314_v38, %v705_v11  ;;  %v674_v20 = vmul.f32 %v1052_v16, %v1309_v36  ;;  %v706_v21 = vmul.f32 %v1084_v17, %v1309_v36  ;;  %v448_v22 = vpop.f32.mrb[15].mxu0  ;;  %v576_v23 = vpop.f32.mrb[15].mxu1 }
  0xfd   :  { %v742_v24 = vadd.f32 %v1314_v38, %v671_v14  ;;  %v774_v25 = vadd.f32 %v1314_v38, %v703_v15  ;;  %v672_v26 = vmul.f32 %v1309_v36, %v448_v22  ;;  %v704_v27 = vmul.f32 %v1309_v36, %v576_v23 }
  0xfe   :  { %v808_v28 = vmax.f32 %v744_v18, 0.0  ;;  %v840_v29 = vmax.f32 %v776_v19, 0.0  ;;  %v745_v30 = vadd.f32 %v1314_v38, %v674_v20  ;;  %v777_v31 = vadd.f32 %v1314_v38, %v706_v21 }
  0xff   :  { %v806_v32 = vmax.f32 %v742_v24, 0.0  ;;  %v838_v33 = vmax.f32 %v774_v25, 0.0  ;;  %v743_v34 = vadd.f32 %v1314_v38, %v672_v26  ;;  %v775_v35 = vadd.f32 %v1314_v38, %v704_v27 }
 0x100   :  { %873 = vst.msk [vmem:[%s1704_s4 + $0x70] sm:$0xff] %vm858_vm2, %v808_v28  ;;  %905 = vst.msk [vmem:[%s1704_s4 + $0x170] sm:$0xff] %vm858_vm2, %v840_v29  ;;  %v809_v37 = vmax.f32 %v745_v30, 0.0  ;;  %v841_v39 = vmax.f32 %v777_v31, 0.0 }
 0x101   :  { %871 = vst.msk [vmem:[%s1704_s4 + $0x60] sm:$0xff] %vm858_vm2, %v806_v32  ;;  %903 = vst.msk [vmem:[%s1704_s4 + $0x160] sm:$0xff] %vm858_vm2, %v838_v33  ;;  %v807_v40 = vmax.f32 %v743_v34, 0.0  ;;  %v839_v41 = vmax.f32 %v775_v35, 0.0  ;;  %v1055_v42 = vpop.f32.mrb[16].mxu0  ;;  %v1087_v43 = vpop.f32.mrb[16].mxu1 }
 0x102   :  { %874 = vst.msk [vmem:[%s1704_s4 + $0x78] sm:$0xff] %vm858_vm2, %v809_v37  ;;  %906 = vst.msk [vmem:[%s1704_s4 + $0x178] sm:$0xff] %vm858_vm2, %v841_v39  ;;  %v677_v44 = vmul.f32 %v1055_v42, %v1309_v36  ;;  %v709_v45 = vmul.f32 %v1087_v43, %v1309_v36  ;;  %v461_v46 = vpop.f32.mrb[17].mxu0  ;;  %v589_v47 = vpop.f32.mrb[17].mxu1 }
 0x103   :  { %872 = vst.msk [vmem:[%s1704_s4 + $0x68] sm:$0xff] %vm858_vm2, %v807_v40  ;;  %904 = vst.msk [vmem:[%s1704_s4 + $0x168] sm:$0xff] %vm858_vm2, %v839_v41  ;;  %v675_v48 = vmul.f32 %v1309_v36, %v461_v46  ;;  %v707_v49 = vmul.f32 %v1309_v36, %v589_v47  ;;  %v1056_v50 = vpop.f32.mrb[18].mxu0  ;;  %v1088_v51 = vpop.f32.mrb[18].mxu1 }
 0x104   :  { %v748_v52 = vadd.f32 %v1314_v38, %v677_v44  ;;  %v780_v53 = vadd.f32 %v1314_v38, %v709_v45  ;;  %v678_v54 = vmul.f32 %v1056_v50, %v1309_v36  ;;  %v710_v55 = vmul.f32 %v1088_v51, %v1309_v36  ;;  %v464_v56 = vpop.f32.mrb[19].mxu0  ;;  %v592_v57 = vpop.f32.mrb[19].mxu1 }
 0x105   :  { %v746_v58 = vadd.f32 %v1314_v38, %v675_v48  ;;  %v778_v59 = vadd.f32 %v1314_v38, %v707_v49  ;;  %v676_v60 = vmul.f32 %v1309_v36, %v464_v56  ;;  %v708_v61 = vmul.f32 %v1309_v36, %v592_v57 }
 0x106   :  { %v812_v62 = vmax.f32 %v748_v52, 0.0  ;;  %v844_v63 = vmax.f32 %v780_v53, 0.0  ;;  %v749_v0 = vadd.f32 %v1314_v38, %v678_v54  ;;  %v781_v1 = vadd.f32 %v1314_v38, %v710_v55 }
 0x107   :  { %v810_v2 = vmax.f32 %v746_v58, 0.0  ;;  %v842_v3 = vmax.f32 %v778_v59, 0.0  ;;  %v747_v4 = vadd.f32 %v1314_v38, %v676_v60  ;;  %v779_v5 = vadd.f32 %v1314_v38, %v708_v61 }
 0x108   :  { %877 = vst.msk [vmem:[%s1704_s4 + $0x90] sm:$0xff] %vm858_vm2, %v812_v62  ;;  %909 = vst.msk [vmem:[%s1704_s4 + $0x190] sm:$0xff] %vm858_vm2, %v844_v63  ;;  %v813_v6 = vmax.f32 %v749_v0, 0.0  ;;  %v845_v7 = vmax.f32 %v781_v1, 0.0 }
 0x109   :  { %875 = vst.msk [vmem:[%s1704_s4 + $0x80] sm:$0xff] %vm858_vm2, %v810_v2  ;;  %907 = vst.msk [vmem:[%s1704_s4 + $0x180] sm:$0xff] %vm858_vm2, %v842_v3  ;;  %v811_v8 = vmax.f32 %v747_v4, 0.0  ;;  %v843_v9 = vmax.f32 %v779_v5, 0.0  ;;  %v1059_v10 = vpop.f32.mrb[20].mxu0  ;;  %v1091_v11 = vpop.f32.mrb[20].mxu1 }
 0x10a   :  { %878 = vst.msk [vmem:[%s1704_s4 + $0x98] sm:$0xff] %vm858_vm2, %v813_v6  ;;  %910 = vst.msk [vmem:[%s1704_s4 + $0x198] sm:$0xff] %vm858_vm2, %v845_v7  ;;  %v681_v12 = vmul.f32 %v1059_v10, %v1309_v36  ;;  %v713_v13 = vmul.f32 %v1091_v11, %v1309_v36  ;;  %v477_v14 = vpop.f32.mrb[21].mxu0  ;;  %v605_v15 = vpop.f32.mrb[21].mxu1 }
 0x10b   :  { %876 = vst.msk [vmem:[%s1704_s4 + $0x88] sm:$0xff] %vm858_vm2, %v811_v8  ;;  %908 = vst.msk [vmem:[%s1704_s4 + $0x188] sm:$0xff] %vm858_vm2, %v843_v9  ;;  %v679_v16 = vmul.f32 %v1309_v36, %v477_v14  ;;  %v711_v17 = vmul.f32 %v1309_v36, %v605_v15  ;;  %v1060_v18 = vpop.f32.mrb[22].mxu0  ;;  %v1092_v19 = vpop.f32.mrb[22].mxu1 }
 0x10c   :  { %v752_v20 = vadd.f32 %v1314_v38, %v681_v12  ;;  %v784_v21 = vadd.f32 %v1314_v38, %v713_v13  ;;  %v682_v22 = vmul.f32 %v1060_v18, %v1309_v36  ;;  %v714_v23 = vmul.f32 %v1092_v19, %v1309_v36  ;;  %v480_v24 = vpop.f32.mrb[23].mxu0  ;;  %v608_v25 = vpop.f32.mrb[23].mxu1 }
 0x10d   :  { %v750_v26 = vadd.f32 %v1314_v38, %v679_v16  ;;  %v782_v27 = vadd.f32 %v1314_v38, %v711_v17  ;;  %v680_v28 = vmul.f32 %v1309_v36, %v480_v24  ;;  %v712_v29 = vmul.f32 %v1309_v36, %v608_v25 }
 0x10e   :  { %v816_v30 = vmax.f32 %v752_v20, 0.0  ;;  %v848_v31 = vmax.f32 %v784_v21, 0.0  ;;  %v753_v32 = vadd.f32 %v1314_v38, %v682_v22  ;;  %v785_v33 = vadd.f32 %v1314_v38, %v714_v23 }
 0x10f   :  { %v814_v34 = vmax.f32 %v750_v26, 0.0  ;;  %v846_v35 = vmax.f32 %v782_v27, 0.0  ;;  %v751_v37 = vadd.f32 %v1314_v38, %v680_v28  ;;  %v783_v39 = vadd.f32 %v1314_v38, %v712_v29 }
 0x110   :  { %881 = vst.msk [vmem:[%s1704_s4 + $0xb0] sm:$0xff] %vm858_vm2, %v816_v30  ;;  %913 = vst.msk [vmem:[%s1704_s4 + $0x1b0] sm:$0xff] %vm858_vm2, %v848_v31  ;;  %v817_v40 = vmax.f32 %v753_v32, 0.0  ;;  %v849_v41 = vmax.f32 %v785_v33, 0.0 }
 0x111   :  { %879 = vst.msk [vmem:[%s1704_s4 + $0xa0] sm:$0xff] %vm858_vm2, %v814_v34  ;;  %911 = vst.msk [vmem:[%s1704_s4 + $0x1a0] sm:$0xff] %vm858_vm2, %v846_v35  ;;  %v815_v42 = vmax.f32 %v751_v37, 0.0  ;;  %v847_v43 = vmax.f32 %v783_v39, 0.0  ;;  %v1063_v44 = vpop.f32.mrb[24].mxu0  ;;  %v1095_v45 = vpop.f32.mrb[24].mxu1 }
 0x112   :  { %882 = vst.msk [vmem:[%s1704_s4 + $0xb8] sm:$0xff] %vm858_vm2, %v817_v40  ;;  %914 = vst.msk [vmem:[%s1704_s4 + $0x1b8] sm:$0xff] %vm858_vm2, %v849_v41  ;;  %v685_v46 = vmul.f32 %v1063_v44, %v1309_v36  ;;  %v717_v47 = vmul.f32 %v1095_v45, %v1309_v36  ;;  %v493_v48 = vpop.f32.mrb[25].mxu0  ;;  %v621_v49 = vpop.f32.mrb[25].mxu1 }
 0x113   :  { %880 = vst.msk [vmem:[%s1704_s4 + $0xa8] sm:$0xff] %vm858_vm2, %v815_v42  ;;  %912 = vst.msk [vmem:[%s1704_s4 + $0x1a8] sm:$0xff] %vm858_vm2, %v847_v43  ;;  %v683_v50 = vmul.f32 %v1309_v36, %v493_v48  ;;  %v715_v51 = vmul.f32 %v1309_v36, %v621_v49  ;;  %v1064_v52 = vpop.f32.mrb[26].mxu0  ;;  %v1096_v53 = vpop.f32.mrb[26].mxu1 }
 0x114   :  { %v756_v54 = vadd.f32 %v1314_v38, %v685_v46  ;;  %v788_v55 = vadd.f32 %v1314_v38, %v717_v47  ;;  %v686_v56 = vmul.f32 %v1064_v52, %v1309_v36  ;;  %v718_v57 = vmul.f32 %v1096_v53, %v1309_v36  ;;  %v496_v58 = vpop.f32.mrb[27].mxu0  ;;  %v624_v59 = vpop.f32.mrb[27].mxu1 }
 0x115   :  { %v754_v60 = vadd.f32 %v1314_v38, %v683_v50  ;;  %v786_v61 = vadd.f32 %v1314_v38, %v715_v51  ;;  %v684_v62 = vmul.f32 %v1309_v36, %v496_v58  ;;  %v716_v63 = vmul.f32 %v1309_v36, %v624_v59 }
 0x116   :  { %v820_v0 = vmax.f32 %v756_v54, 0.0  ;;  %v852_v1 = vmax.f32 %v788_v55, 0.0  ;;  %v757_v2 = vadd.f32 %v1314_v38, %v686_v56  ;;  %v789_v3 = vadd.f32 %v1314_v38, %v718_v57 }
 0x117   :  { %v818_v4 = vmax.f32 %v754_v60, 0.0  ;;  %v850_v5 = vmax.f32 %v786_v61, 0.0  ;;  %v755_v6 = vadd.f32 %v1314_v38, %v684_v62  ;;  %v787_v7 = vadd.f32 %v1314_v38, %v716_v63 }
 0x118   :  { %885 = vst.msk [vmem:[%s1704_s4 + $0xd0] sm:$0xff] %vm858_vm2, %v820_v0  ;;  %917 = vst.msk [vmem:[%s1704_s4 + $0x1d0] sm:$0xff] %vm858_vm2, %v852_v1  ;;  %v821_v8 = vmax.f32 %v757_v2, 0.0  ;;  %v853_v9 = vmax.f32 %v789_v3, 0.0 }
 0x119   :  { %883 = vst.msk [vmem:[%s1704_s4 + $0xc0] sm:$0xff] %vm858_vm2, %v818_v4  ;;  %915 = vst.msk [vmem:[%s1704_s4 + $0x1c0] sm:$0xff] %vm858_vm2, %v850_v5  ;;  %v819_v10 = vmax.f32 %v755_v6, 0.0  ;;  %v851_v11 = vmax.f32 %v787_v7, 0.0  ;;  %v1067_v12 = vpop.f32.mrb[28].mxu0  ;;  %v1099_v13 = vpop.f32.mrb[28].mxu1 }
 0x11a   :  { %886 = vst.msk [vmem:[%s1704_s4 + $0xd8] sm:$0xff] %vm858_vm2, %v821_v8  ;;  %918 = vst.msk [vmem:[%s1704_s4 + $0x1d8] sm:$0xff] %vm858_vm2, %v853_v9  ;;  %v689_v14 = vmul.f32 %v1067_v12, %v1309_v36  ;;  %v721_v15 = vmul.f32 %v1099_v13, %v1309_v36  ;;  %v509_v16 = vpop.f32.mrb[29].mxu0  ;;  %v637_v17 = vpop.f32.mrb[29].mxu1 }
 0x11b   :  { %884 = vst.msk [vmem:[%s1704_s4 + $0xc8] sm:$0xff] %vm858_vm2, %v819_v10  ;;  %916 = vst.msk [vmem:[%s1704_s4 + $0x1c8] sm:$0xff] %vm858_vm2, %v851_v11  ;;  %v687_v18 = vmul.f32 %v1309_v36, %v509_v16  ;;  %v719_v19 = vmul.f32 %v1309_v36, %v637_v17  ;;  %v1068_v20 = vpop.f32.mrb[30].mxu0  ;;  %v1100_v21 = vpop.f32.mrb[30].mxu1 }
 0x11c   :  { %v760_v22 = vadd.f32 %v1314_v38, %v689_v14  ;;  %v792_v23 = vadd.f32 %v1314_v38, %v721_v15  ;;  %v690_v24 = vmul.f32 %v1068_v20, %v1309_v36  ;;  %v722_v25 = vmul.f32 %v1100_v21, %v1309_v36  ;;  %v512_v26 = vpop.f32.mrb[31].mxu0  ;;  %v640_v27 = vpop.f32.mrb[31].mxu1 }
 0x11d   :  { %v758_v28 = vadd.f32 %v1314_v38, %v687_v18  ;;  %v790_v29 = vadd.f32 %v1314_v38, %v719_v19  ;;  %v688_v30 = vmul.f32 %v1309_v36, %v512_v26  ;;  %v720_v31 = vmul.f32 %v1309_v36, %v640_v27 }
 0x11e   :  { %v824_v32 = vmax.f32 %v760_v22, 0.0  ;;  %v856_v33 = vmax.f32 %v792_v23, 0.0  ;;  %v761_v34 = vadd.f32 %v1314_v38, %v690_v24  ;;  %v793_v35 = vadd.f32 %v1314_v38, %v722_v25 }
 0x11f   :  { %v822_v37 = vmax.f32 %v758_v28, 0.0  ;;  %v854_v39 = vmax.f32 %v790_v29, 0.0  ;;  %v759_v40 = vadd.f32 %v1314_v38, %v688_v30  ;;  %v791_v41 = vadd.f32 %v1314_v38, %v720_v31 }
 0x120   :  { %889 = vst.msk [vmem:[%s1704_s4 + $0xf0] sm:$0xff] %vm858_vm2, %v824_v32  ;;  %921 = vst.msk [vmem:[%s1704_s4 + $0x1f0] sm:$0xff] %vm858_vm2, %v856_v33  ;;  %v825_v36 = vmax.f32 %v761_v34, 0.0  ;;  %v857_v42 = vmax.f32 %v793_v35, 0.0 }
 0x121   :  { %887 = vst.msk [vmem:[%s1704_s4 + $0xe0] sm:$0xff] %vm858_vm2, %v822_v37  ;;  %919 = vst.msk [vmem:[%s1704_s4 + $0x1e0] sm:$0xff] %vm858_vm2, %v854_v39  ;;  %v823_v38 = vmax.f32 %v759_v40, 0.0  ;;  %v855_v43 = vmax.f32 %v791_v41, 0.0 }
 0x122   :  { %890 = vst.msk [vmem:[%s1704_s4 + $0xf8] sm:$0xff] %vm858_vm2, %v825_v36  ;;  %922 = vst.msk [vmem:[%s1704_s4 + $0x1f8] sm:$0xff] %vm858_vm2, %v857_v42 }
 0x123   :  { %888 = vst.msk [vmem:[%s1704_s4 + $0xe8] sm:$0xff] %vm858_vm2, %v823_v38  ;;  %920 = vst.msk [vmem:[%s1704_s4 + $0x1e8] sm:$0xff] %vm858_vm2, %v855_v43 }

// kernel: resblk_forward.3
= control target key start
LH: loop header
LB: loop body
LE: loop exit
PB: predicated region body
PF: predicated region fallthrough
CT: control target
= control target key end

     0   :  { %vm1144_vm0 = vcmask 1041408   ;;  %vm1047_vm1 = vcmask 31744   ;;  %vm290_vm2 = vcmask 588800   ;;  %vm387_vm3 = vcmask 1043456   ;;  %s3033_s2 = inlined_call_operand.vmem [shape: bf16[72,8], index: 2, kind: input, shape index: {}]   ;;  %s3034_s5 = inlined_call_operand.vmem [shape: bf16[4,8], index: 5, kind: input, shape index: {}]   ;;  %s3035_s1 = inlined_call_operand.vmem [shape: bf16[512,4], index: 1, kind: input, shape index: {}]   ;;  %s3036_s0 = inlined_call_operand.vmem [shape: bf16[512,72], index: 0, kind: input, shape index: {}]   ;;  %s3037_s6 = inlined_call_operand.vmem [shape: f32[1,8], index: 6, kind: input, shape index: {}]   ;;  %s3038_s7 = inlined_call_operand.vmem [shape: f32[1,8], index: 7, kind: input, shape index: {}]   ;;  %s3039_s3 = inlined_call_operand.vmem [shape: f32[1,8], index: 3, kind: input, shape index: {}]   ;;  %s3040_s4 = inlined_call_operand.vmem [shape: f32[1,8], index: 4, kind: input, shape index: {}]   ;;  %s3041_s8 = inlined_call_operand.vmem [shape: f32[512,8], index: 8, kind: output, shape index: {}]  }
   0x1   :  { %v2125_v0 = vld [vmem:[%s3033_s2] sm:$0xff]   ;;  %v2126_v1 = vld [vmem:[%s3033_s2 + $0x8] sm:$0xff]   ;;  %v2127_v2 = vld [vmem:[%s3033_s2 + $0x10] sm:$0xff]   ;;  %vm1707_vm4 = vcmask 64512  }
   0x2   :  { %1983 = vmatprep.subr.bf16.mxu0 %v2125_v0  ;;  %v886_v3 = vld [vmem:[%s3034_s5] sm:$0x3]  ;;  %v2131_v6 = vld [vmem:[%s3035_s1 + $0x8] sm:$0xff]   ;;  %v2128_v8 = vld [vmem:[%s3033_s2 + $0x18] sm:$0xff]  }
   0x3   :  { %1984 = vmatpush3.bf16.msra.mxu0 %v2125_v0  ;;  %2124 = vmatprep.subr.msk.bf16.mxu1 %vm1144_vm0, %v886_v3  ;;  %v1146_v4 = vsel %vm1144_vm0, %v886_v3, 0  ;;  %v2130_v5 = vld [vmem:[%s3035_s1] sm:$0xff]   ;;  %v2134_v9 = vld [vmem:[%s3035_s1 + $0x10] sm:$0xff]   ;;  %v2135_v11 = vld [vmem:[%s3035_s1 + $0x18] sm:$0xff]  }
   0x4   :  { %1985 = vmatprep.subr.bf16.mxu0 %v2126_v1  ;;  %2058 = vmatpush3.bf16.msra.mxu1 %v1146_v4  ;;  %v2132_v7 = vld [vmem:[%s3036_s0] sm:$0xff]   ;;  %v2133_v14 = vld [vmem:[%s3036_s0 + $0x8] sm:$0xff]   ;;  %v2136_v15 = vld [vmem:[%s3036_s0 + $0x10] sm:$0xff]  }
   0x5   :  { %2059 = vmatprep.mubr.msk.bf16.mxu1 %vm1047_vm1, %v2130_v5  ;;  %1993 = vmatprep.mubr.msk.bf16.mxu0 %vm290_vm2, %v2132_v7  ;;  %v2129_v10 = vld [vmem:[%s3033_s2 + $0x20] ss:$0 sps:$4 sm:$0xff]   ;;  %v2139_v16 = vld [vmem:[%s3035_s1 + $0x28] sm:$0xff]   ;;  %v2142_v17 = vld [vmem:[%s3035_s1 + $0x30] sm:$0xff]  }
   0x6   :  { %v2138_v12 = vld [vmem:[%s3035_s1 + $0x20] sm:$0xff]   ;;  %v389_v13 = vsel %vm387_vm3, %v2129_v10, 0  ;;  %v2137_v18 = vld [vmem:[%s3036_s0 + $0x18] sm:$0xff]   ;;  %v2141_v22 = vld [vmem:[%s3036_s0 + $0x28] sm:$0xff]  }
   0x7   :  { %1986 = vmatpush3.bf16.msra.mxu0 %v2126_v1  ;;  %2060 = vmatmul.mubr.msk.bf16.vlgmr.msra.gmra.mrb[0].mxu1 %vm1047_vm1, %v2131_v6  ;;  %v2140_v19 = vld [vmem:[%s3036_s0 + $0x20] sm:$0xff]   ;;  %v2143_v20 = vld [vmem:[%s3035_s1 + $0x38] sm:$0xff]   ;;  %v2144_v23 = vld [vmem:[%s3036_s0 + $0x30] sm:$0xff]  }
   0x8   :  { %1987 = vmatprep.subr.bf16.mxu0 %v2127_v2  ;;  %2063 = vmatprep.mubr.msk.bf16.mxu1 %vm1047_vm1, %v2134_v9  ;;  %v2146_v21 = vld [vmem:[%s3035_s1 + $0x40] sm:$0xff]   ;;  %v2147_v24 = vld [vmem:[%s3035_s1 + $0x48] sm:$0xff]   ;;  %v2150_v25 = vld [vmem:[%s3035_s1 + $0x50] sm:$0xff]  }
   0x9   :  { %v2145_v26 = vld [vmem:[%s3036_s0 + $0x38] sm:$0xff]   ;;  %v2148_v27 = vld [vmem:[%s3036_s0 + $0x40] sm:$0xff]   ;;  %v2149_v30 = vld [vmem:[%s3036_s0 + $0x48] sm:$0xff]  }
   0xa   :  { %v2151_v28 = vld [vmem:[%s3035_s1 + $0x58] sm:$0xff]   ;;  %v2154_v29 = vld [vmem:[%s3035_s1 + $0x60] sm:$0xff]   ;;  %v2152_v31 = vld [vmem:[%s3036_s0 + $0x50] sm:$0xff]  }
   0xb   :  { %1988 = vmatpush3.bf16.msra.mxu0 %v2127_v2  ;;  %v2155_v32 = vld [vmem:[%s3035_s1 + $0x68] sm:$0xff]   ;;  %v2158_v33 = vld [vmem:[%s3035_s1 + $0x70] sm:$0xff]   ;;  %v2153_v34 = vld [vmem:[%s3036_s0 + $0x58] sm:$0xff]  }
   0xc   :  { %1989 = vmatprep.subr.bf16.mxu0 %v2128_v8  ;;  %v2156_v35 = vld [vmem:[%s3036_s0 + $0x60] sm:$0xff]   ;;  %v2159_v36 = vld [vmem:[%s3035_s1 + $0x78] sm:$0xff]   ;;  %v2157_v38 = vld [vmem:[%s3036_s0 + $0x68] sm:$0xff]  }
   0xd   :  { %v2162_v37 = vld [vmem:[%s3035_s1 + $0x80] sm:$0xff]   ;;  %v2160_v39 = vld [vmem:[%s3036_s0 + $0x70] sm:$0xff]   ;;  %v2163_v40 = vld [vmem:[%s3035_s1 + $0x88] sm:$0xff]  }
   0xe   :  { %v2166_v41 = vld [vmem:[%s3035_s1 + $0x90] sm:$0xff]   ;;  %v2161_v42 = vld [vmem:[%s3036_s0 + $0x78] sm:$0xff]   ;;  %v2164_v43 = vld [vmem:[%s3036_s0 + $0x80] sm:$0xff]  }
   0xf   :  { %1990 = vmatpush3.bf16.msra.mxu0 %v2128_v8  ;;  %2064 = vmatmul.mubr.msk.bf16.gmra.mrb[4].mxu1 %vm1047_vm1, %v2135_v11  ;;  %v2167_v44 = vld [vmem:[%s3035_s1 + $0x98] sm:$0xff]   ;;  %v2170_v45 = vld [vmem:[%s3035_s1 + $0xa0] sm:$0xff]   ;;  %v2165_v46 = vld [vmem:[%s3036_s0 + $0x88] sm:$0xff]  }
  0x10   :  { %2123 = vmatprep.subr.msk.bf16.mxu0 %vm387_vm3, %v2129_v10  ;;  %2067 = vmatprep.mubr.msk.bf16.mxu1 %vm1047_vm1, %v2138_v12  ;;  %v2168_v47 = vld [vmem:[%s3036_s0 + $0x90] sm:$0xff]   ;;  %v2171_v48 = vld [vmem:[%s3035_s1 + $0xa8] sm:$0xff]   ;;  %v2169_v50 = vld [vmem:[%s3036_s0 + $0x98] sm:$0xff]  }
  0x11   :  { %v2174_v49 = vld [vmem:[%s3035_s1 + $0xb0] sm:$0xff]   ;;  %v2172_v51 = vld [vmem:[%s3036_s0 + $0xa0] sm:$0xff]   ;;  %v2175_v52 = vld [vmem:[%s3035_s1 + $0xb8] sm:$0xff]  }
  0x12   :  { %v2178_v53 = vld [vmem:[%s3035_s1 + $0xc0] sm:$0xff]   ;;  %v2173_v54 = vld [vmem:[%s3036_s0 + $0xa8] sm:$0xff]   ;;  %v2176_v55 = vld [vmem:[%s3036_s0 + $0xb0] sm:$0xff]  }
  0x13   :  { %1992 = vmatpush3.bf16.msra.mxu0 %v389_v13  ;;  %v2179_v56 = vld [vmem:[%s3035_s1 + $0xc8] sm:$0xff]   ;;  %v2182_v57 = vld [vmem:[%s3035_s1 + $0xd0] sm:$0xff]   ;;  %v2177_v58 = vld [vmem:[%s3036_s0 + $0xb8] sm:$0xff]  }
  0x14   :  { %v2180_v59 = vld [vmem:[%s3036_s0 + $0xc0] sm:$0xff]   ;;  %v2183_v60 = vld [vmem:[%s3035_s1 + $0xd8] sm:$0xff]   ;;  %v2181_v62 = vld [vmem:[%s3036_s0 + $0xc8] sm:$0xff]  }
  0x15   :  { %v2186_v61 = vld [vmem:[%s3035_s1 + $0xe0] sm:$0xff]   ;;  %v2184_v63 = vld [vmem:[%s3036_s0 + $0xd0] sm:$0xff]   ;;  %v2187_v0 = vld [vmem:[%s3035_s1 + $0xe8] sm:$0xff]  }
  0x16   :  { %1994 = vmatmul.mubr.msk.bf16.vlgmr.msra.gmra.mrb[0].mxu0 %vm290_vm2, %v2133_v14  ;;  %v2190_v1 = vld [vmem:[%s3035_s1 + $0xf0] sm:$0xff]   ;;  %v2185_v2 = vld [vmem:[%s3036_s0 + $0xd8] sm:$0xff]   ;;  %v2188_v3 = vld [vmem:[%s3036_s0 + $0xe0] sm:$0xff]  }
  0x17   :  { %1997 = vmatprep.mubr.msk.bf16.mxu0 %vm290_vm2, %v2136_v15  ;;  %2068 = vmatmul.mubr.msk.bf16.gmra.mrb[8].mxu1 %vm1047_vm1, %v2139_v16  ;;  %v2191_v4 = vld [vmem:[%s3035_s1 + $0xf8] sm:$0xff]   ;;  %v2189_v5 = vld [vmem:[%s3036_s0 + $0xe8] sm:$0xff]   ;;  %v2192_v6 = vld [vmem:[%s3036_s0 + $0xf0] sm:$0xff]  }
  0x18   :  { %2071 = vmatprep.mubr.msk.bf16.mxu1 %vm1047_vm1, %v2142_v17  ;;  %v2193_v7 = vld [vmem:[%s3036_s0 + $0xf8] sm:$0xff]   ;;  %v2520_v12 = vld [vmem:[%s3037_s6] ss:$0 sm:$0xff] }
  0x19   :  { %v2526_v17 = vld [vmem:[%s3038_s7] ss:$0 sm:$0xff] }
  0x1e   :  { %1998 = vmatmul.mubr.msk.bf16.gmra.mrb[4].mxu0 %vm290_vm2, %v2137_v18 }
  0x1f   :  { %2001 = vmatprep.mubr.msk.bf16.mxu0 %vm290_vm2, %v2140_v19  ;;  %2072 = vmatmul.mubr.msk.bf16.gmra.mrb[12].mxu1 %vm1047_vm1, %v2143_v20  ;;  %v2532_v19 = vld [vmem:[%s3039_s3] ss:$0 sm:$0xff] }
  0x20   :  { %2075 = vmatprep.mubr.msk.bf16.mxu1 %vm1047_vm1, %v2146_v21 }
  0x26   :  { %2002 = vmatmul.mubr.msk.bf16.gmra.mrb[8].mxu0 %vm290_vm2, %v2141_v22  ;;  %v2537_v22 = vld [vmem:[%s3040_s4] ss:$0 sm:$0xff] }
  0x27   :  { %2005 = vmatprep.mubr.msk.bf16.mxu0 %vm290_vm2, %v2144_v23  ;;  %2076 = vmatmul.mubr.msk.bf16.gmra.mrb[16].mxu1 %vm1047_vm1, %v2147_v24 }
  0x28   :  { %2079 = vmatprep.mubr.msk.bf16.mxu1 %vm1047_vm1, %v2150_v25 }
  0x2e   :  { %2006 = vmatmul.mubr.msk.bf16.gmra.mrb[12].mxu0 %vm290_vm2, %v2145_v26 }
  0x2f   :  { %2009 = vmatprep.mubr.msk.bf16.mxu0 %vm290_vm2, %v2148_v27  ;;  %2080 = vmatmul.mubr.msk.bf16.gmra.mrb[20].mxu1 %vm1047_vm1, %v2151_v28 }
  0x30   :  { %2083 = vmatprep.mubr.msk.bf16.mxu1 %vm1047_vm1, %v2154_v29 }
  0x36   :  { %2010 = vmatmul.mubr.msk.bf16.gmra.mrb[16].mxu0 %vm290_vm2, %v2149_v30 }
  0x37   :  { %2013 = vmatprep.mubr.msk.bf16.mxu0 %vm290_vm2, %v2152_v31  ;;  %2084 = vmatmul.mubr.msk.bf16.gmra.mrb[24].mxu1 %vm1047_vm1, %v2155_v32 }
  0x38   :  { %2087 = vmatprep.mubr.msk.bf16.mxu1 %vm1047_vm1, %v2158_v33 }
  0x3e   :  { %2014 = vmatmul.mubr.msk.bf16.gmra.mrb[20].mxu0 %vm290_vm2, %v2153_v34 }
  0x3f   :  { %2017 = vmatprep.mubr.msk.bf16.mxu0 %vm290_vm2, %v2156_v35  ;;  %2088 = vmatmul.mubr.msk.bf16.gmra.mrb[28].mxu1 %vm1047_vm1, %v2159_v36 }
  0x40   :  { %2091 = vmatprep.mubr.msk.bf16.mxu1 %vm1047_vm1, %v2162_v37 }
  0x46   :  { %2018 = vmatmul.mubr.msk.bf16.gmra.mrb[24].mxu0 %vm290_vm2, %v2157_v38 }
  0x47   :  { %2021 = vmatprep.mubr.msk.bf16.mxu0 %vm290_vm2, %v2160_v39  ;;  %2092 = vmatmul.mubr.msk.bf16.gmra.mrb[32].mxu1 %vm1047_vm1, %v2163_v40 }
  0x48   :  { %2095 = vmatprep.mubr.msk.bf16.mxu1 %vm1047_vm1, %v2166_v41 }
  0x4e   :  { %2022 = vmatmul.mubr.msk.bf16.gmra.mrb[28].mxu0 %vm290_vm2, %v2161_v42 }
  0x4f   :  { %2025 = vmatprep.mubr.msk.bf16.mxu0 %vm290_vm2, %v2164_v43  ;;  %2096 = vmatmul.mubr.msk.bf16.gmra.mrb[36].mxu1 %vm1047_vm1, %v2167_v44 }
  0x50   :  { %2099 = vmatprep.mubr.msk.bf16.mxu1 %vm1047_vm1, %v2170_v45 }
  0x56   :  { %2026 = vmatmul.mubr.msk.bf16.gmra.mrb[32].mxu0 %vm290_vm2, %v2165_v46 }
  0x57   :  { %2029 = vmatprep.mubr.msk.bf16.mxu0 %vm290_vm2, %v2168_v47  ;;  %2100 = vmatmul.mubr.msk.bf16.gmra.mrb[40].mxu1 %vm1047_vm1, %v2171_v48 }
  0x58   :  { %2103 = vmatprep.mubr.msk.bf16.mxu1 %vm1047_vm1, %v2174_v49 }
  0x5e   :  { %2030 = vmatmul.mubr.msk.bf16.gmra.mrb[36].mxu0 %vm290_vm2, %v2169_v50 }
  0x5f   :  { %2033 = vmatprep.mubr.msk.bf16.mxu0 %vm290_vm2, %v2172_v51  ;;  %2104 = vmatmul.mubr.msk.bf16.gmra.mrb[44].mxu1 %vm1047_vm1, %v2175_v52 }
  0x60   :  { %2107 = vmatprep.mubr.msk.bf16.mxu1 %vm1047_vm1, %v2178_v53 }
  0x66   :  { %2034 = vmatmul.mubr.msk.bf16.gmra.mrb[40].mxu0 %vm290_vm2, %v2173_v54 }
  0x67   :  { %2037 = vmatprep.mubr.msk.bf16.mxu0 %vm290_vm2, %v2176_v55  ;;  %2108 = vmatmul.mubr.msk.bf16.gmra.mrb[48].mxu1 %vm1047_vm1, %v2179_v56 }
  0x68   :  { %2111 = vmatprep.mubr.msk.bf16.mxu1 %vm1047_vm1, %v2182_v57 }
  0x6e   :  { %2038 = vmatmul.mubr.msk.bf16.gmra.mrb[44].mxu0 %vm290_vm2, %v2177_v58 }
  0x6f   :  { %2041 = vmatprep.mubr.msk.bf16.mxu0 %vm290_vm2, %v2180_v59  ;;  %2112 = vmatmul.mubr.msk.bf16.gmra.mrb[52].mxu1 %vm1047_vm1, %v2183_v60 }
  0x70   :  { %2115 = vmatprep.mubr.msk.bf16.mxu1 %vm1047_vm1, %v2186_v61 }
  0x76   :  { %2042 = vmatmul.mubr.msk.bf16.gmra.mrb[48].mxu0 %vm290_vm2, %v2181_v62 }
  0x77   :  { %2045 = vmatprep.mubr.msk.bf16.mxu0 %vm290_vm2, %v2184_v63  ;;  %2116 = vmatmul.mubr.msk.bf16.gmra.mrb[56].mxu1 %vm1047_vm1, %v2187_v0 }
  0x78   :  { %2119 = vmatprep.mubr.msk.bf16.mxu1 %vm1047_vm1, %v2190_v1 }
  0x7e   :  { %2046 = vmatmul.mubr.msk.bf16.gmra.mrb[52].mxu0 %vm290_vm2, %v2185_v2 }
  0x7f   :  { %2049 = vmatprep.mubr.msk.bf16.mxu0 %vm290_vm2, %v2188_v3  ;;  %2120 = vmatmul.mubr.msk.bf16.gmra.mrb[60].mxu1 %vm1047_vm1, %v2191_v4 }
  0x86   :  { %2050 = vmatmul.mubr.msk.bf16.gmra.mrb[56].mxu0 %vm290_vm2, %v2189_v5 }
  0x87   :  { %2053 = vmatprep.mubr.msk.bf16.mxu0 %vm290_vm2, %v2192_v6 }
  0x8e   :  { %2054 = vmatmul.mubr.msk.bf16.gmra.mrb[60].mxu0 %vm290_vm2, %v2193_v7 }
  0xda   :  { %v2061_v8 = vpop.f32.mrb[0].mxu1 }
  0xdb   :  { %v1182_v9 = vpop.f32.mrb[1].mxu1  ;;  %v1446_v15 = vmul.f32 %v2061_v8, %v2520_v12 }
  0xdc   :  { %v2062_v10 = vpop.f32.mrb[2].mxu1  ;;  %v1444_v18 = vmul.f32 %v2520_v12, %v1182_v9 }
  0xdd   :  { %v1185_v11 = vpop.f32.mrb[3].mxu1  ;;  %v1517_v23 = vadd.f32 %v2526_v17, %v1446_v15  ;;  %v1447_v24 = vmul.f32 %v2062_v10, %v2520_v12 }
  0xde   :  { %v1515_v27 = vadd.f32 %v2526_v17, %v1444_v18  ;;  %v1445_v28 = vmul.f32 %v2520_v12, %v1185_v11 }
  0xdf   :  { %v1518_v38 = vadd.f32 %v2526_v17, %v1447_v24 }
  0xe0   :  { %v1516_v43 = vadd.f32 %v2526_v17, %v1445_v28 }
  0xe2   :  { %v2065_v13 = vpop.f32.mrb[4].mxu1 }
  0xe3   :  { %v1198_v14 = vpop.f32.mrb[5].mxu1  ;;  %v1450_v41 = vmul.f32 %v2065_v13, %v2520_v12 }
  0xe4   :  { %v2066_v16 = vpop.f32.mrb[6].mxu1  ;;  %v1448_v46 = vmul.f32 %v2520_v12, %v1198_v14 }
  0xe5   :  { %v1201_v20 = vpop.f32.mrb[7].mxu1  ;;  %v1521_v54 = vadd.f32 %v2526_v17, %v1450_v41  ;;  %v1451_v55 = vmul.f32 %v2066_v16, %v2520_v12 }
  0xe6   :  { %v1519_v59 = vadd.f32 %v2526_v17, %v1448_v46  ;;  %v1449_v60 = vmul.f32 %v2520_v12, %v1201_v20 }
  0xe7   :  { %v1522_v6 = vadd.f32 %v2526_v17, %v1451_v55 }
  0xe8   :  { %v1520_v11 = vadd.f32 %v2526_v17, %v1449_v60 }
  0xe9   :  { %v1995_v21 = vpop.f32.mrb[0].mxu0 }
  0xea   :  { %v689_v25 = vmul.f32 %v1995_v21, %v2532_v19  ;;  %v425_v26 = vpop.f32.mrb[1].mxu0  ;;  %v2069_v34 = vpop.f32.mrb[8].mxu1 }
  0xeb   :  { %v687_v29 = vmul.f32 %v2532_v19, %v425_v26  ;;  %v1996_v30 = vpop.f32.mrb[2].mxu0  ;;  %v1214_v37 = vpop.f32.mrb[9].mxu1  ;;  %v1454_v9 = vmul.f32 %v2069_v34, %v2520_v12 }
  0xec   :  { %v760_v31 = vadd.f32 %v2537_v22, %v689_v25  ;;  %v690_v32 = vmul.f32 %v1996_v30, %v2532_v19  ;;  %v428_v33 = vpop.f32.mrb[3].mxu0  ;;  %v2070_v42 = vpop.f32.mrb[10].mxu1  ;;  %v1452_v15 = vmul.f32 %v2520_v12, %v1214_v37 }
  0xed   :  { %v758_v35 = vadd.f32 %v2537_v22, %v687_v29  ;;  %v688_v36 = vmul.f32 %v2532_v19, %v428_v33  ;;  %v1217_v47 = vpop.f32.mrb[11].mxu1  ;;  %v1525_v26 = vadd.f32 %v2526_v17, %v1454_v9 }
  0xee   :  { %v1581_v39 = vadd.f32 %v1517_v23, %v760_v31  ;;  %v761_v40 = vadd.f32 %v2537_v22, %v690_v32  ;;  %v1523_v31 = vadd.f32 %v2526_v17, %v1452_v15  ;;  %v1453_v32 = vmul.f32 %v2520_v12, %v1217_v47 }
  0xef   :  { %v1579_v44 = vadd.f32 %v1515_v27, %v758_v35  ;;  %v759_v45 = vadd.f32 %v2537_v22, %v688_v36  ;;  %v1455_v27 = vmul.f32 %v2070_v42, %v2520_v12 }
  0xf0   :  { %v1645_v48 = vmax.f32 %v1581_v39, 0.0  ;;  %v1582_v49 = vadd.f32 %v1518_v38, %v761_v40  ;;  %v1524_v47 = vadd.f32 %v2526_v17, %v1453_v32 }
  0xf1   :  { %v1643_v50 = vmax.f32 %v1579_v44, 0.0  ;;  %v1580_v51 = vadd.f32 %v1516_v43, %v759_v45  ;;  %v1999_v52 = vpop.f32.mrb[4].mxu0  ;;  %v1526_v42 = vadd.f32 %v2526_v17, %v1455_v27 }
  0xf2   :  { %1710 = vst.msk [vmem:[%s3041_s8 + $0x10] sm:$0xff] %vm1707_vm4, %v1645_v48  ;;  %v1646_v53 = vmax.f32 %v1582_v49, 0.0  ;;  %v693_v56 = vmul.f32 %v1999_v52, %v2532_v19  ;;  %v441_v57 = vpop.f32.mrb[5].mxu0  ;;  %v2073_v2 = vpop.f32.mrb[12].mxu1 }
  0xf3   :  { %1708 = vst.msk [vmem:[%s3041_s8] sm:$0xff] %vm1707_vm4, %v1643_v50  ;;  %v1644_v58 = vmax.f32 %v1580_v51, 0.0  ;;  %v691_v61 = vmul.f32 %v2532_v19, %v441_v57  ;;  %v2000_v62 = vpop.f32.mrb[6].mxu0  ;;  %v1230_v5 = vpop.f32.mrb[13].mxu1  ;;  %v1458_v45 = vmul.f32 %v2073_v2, %v2520_v12 }
  0xf4   :  { %1711 = vst.msk [vmem:[%s3041_s8 + $0x18] sm:$0xff] %vm1707_vm4, %v1646_v53  ;;  %v764_v63 = vadd.f32 %v2537_v22, %v693_v56  ;;  %v694_v0 = vmul.f32 %v2000_v62, %v2532_v19  ;;  %v444_v1 = vpop.f32.mrb[7].mxu0  ;;  %v2074_v10 = vpop.f32.mrb[14].mxu1  ;;  %v1456_v50 = vmul.f32 %v2520_v12, %v1230_v5 }
  0xf5   :  { %1709 = vst.msk [vmem:[%s3041_s8 + $0x8] sm:$0xff] %vm1707_vm4, %v1644_v58  ;;  %v762_v3 = vadd.f32 %v2537_v22, %v691_v61  ;;  %v692_v4 = vmul.f32 %v2532_v19, %v444_v1  ;;  %v1233_v16 = vpop.f32.mrb[15].mxu1  ;;  %v1529_v58 = vadd.f32 %v2526_v17, %v1458_v45 }
  0xf6   :  { %v1585_v7 = vadd.f32 %v1521_v54, %v764_v63  ;;  %v765_v8 = vadd.f32 %v2537_v22, %v694_v0  ;;  %v1527_v63 = vadd.f32 %v2526_v17, %v1456_v50  ;;  %v1457_v0 = vmul.f32 %v2520_v12, %v1233_v16 }
  0xf7   :  { %v1583_v13 = vadd.f32 %v1519_v59, %v762_v3  ;;  %v763_v14 = vadd.f32 %v2537_v22, %v692_v4  ;;  %v1459_v59 = vmul.f32 %v2074_v10, %v2520_v12 }
  0xf8   :  { %v1649_v18 = vmax.f32 %v1585_v7, 0.0  ;;  %v1586_v20 = vadd.f32 %v1522_v6, %v765_v8  ;;  %v1528_v16 = vadd.f32 %v2526_v17, %v1457_v0 }
  0xf9   :  { %v1647_v21 = vmax.f32 %v1583_v13, 0.0  ;;  %v1584_v23 = vadd.f32 %v1520_v11, %v763_v14  ;;  %v2003_v24 = vpop.f32.mrb[8].mxu0  ;;  %v1530_v10 = vadd.f32 %v2526_v17, %v1459_v59 }
  0xfa   :  { %1714 = vst.msk [vmem:[%s3041_s8 + $0x30] sm:$0xff] %vm1707_vm4, %v1649_v18  ;;  %v1650_v25 = vmax.f32 %v1586_v20, 0.0  ;;  %v697_v28 = vmul.f32 %v2003_v24, %v2532_v19  ;;  %v457_v29 = vpop.f32.mrb[9].mxu0  ;;  %v2077_v38 = vpop.f32.mrb[16].mxu1 }
  0xfb   :  { %1712 = vst.msk [vmem:[%s3041_s8 + $0x20] sm:$0xff] %vm1707_vm4, %v1647_v21  ;;  %v1648_v30 = vmax.f32 %v1584_v23, 0.0  ;;  %v695_v33 = vmul.f32 %v2532_v19, %v457_v29  ;;  %v2004_v34 = vpop.f32.mrb[10].mxu0  ;;  %v1246_v41 = vpop.f32.mrb[17].mxu1  ;;  %v1462_v14 = vmul.f32 %v2077_v38, %v2520_v12 }
  0xfc   :  { %1715 = vst.msk [vmem:[%s3041_s8 + $0x38] sm:$0xff] %vm1707_vm4, %v1650_v25  ;;  %v768_v35 = vadd.f32 %v2537_v22, %v697_v28  ;;  %v698_v36 = vmul.f32 %v2004_v34, %v2532_v19  ;;  %v460_v37 = vpop.f32.mrb[11].mxu0  ;;  %v2078_v46 = vpop.f32.mrb[18].mxu1  ;;  %v1460_v21 = vmul.f32 %v2520_v12, %v1246_v41 }
  0xfd   :  { %1713 = vst.msk [vmem:[%s3041_s8 + $0x28] sm:$0xff] %vm1707_vm4, %v1648_v30  ;;  %v766_v39 = vadd.f32 %v2537_v22, %v695_v33  ;;  %v696_v40 = vmul.f32 %v2532_v19, %v460_v37  ;;  %v1249_v51 = vpop.f32.mrb[19].mxu1  ;;  %v1533_v30 = vadd.f32 %v2526_v17, %v1462_v14 }
  0xfe   :  { %v1589_v43 = vadd.f32 %v1525_v26, %v768_v35  ;;  %v769_v44 = vadd.f32 %v2537_v22, %v698_v36  ;;  %v1531_v35 = vadd.f32 %v2526_v17, %v1460_v21  ;;  %v1461_v36 = vmul.f32 %v2520_v12, %v1249_v51 }
  0xff   :  { %v1587_v48 = vadd.f32 %v1523_v31, %v766_v39  ;;  %v767_v49 = vadd.f32 %v2537_v22, %v696_v40  ;;  %v1463_v31 = vmul.f32 %v2078_v46, %v2520_v12 }
 0x100   :  { %v1653_v52 = vmax.f32 %v1589_v43, 0.0  ;;  %v1590_v53 = vadd.f32 %v1526_v42, %v769_v44  ;;  %v1532_v51 = vadd.f32 %v2526_v17, %v1461_v36 }
 0x101   :  { %v1651_v54 = vmax.f32 %v1587_v48, 0.0  ;;  %v1588_v55 = vadd.f32 %v1524_v47, %v767_v49  ;;  %v2007_v56 = vpop.f32.mrb[12].mxu0  ;;  %v1534_v46 = vadd.f32 %v2526_v17, %v1463_v31 }
 0x102   :  { %1718 = vst.msk [vmem:[%s3041_s8 + $0x50] sm:$0xff] %vm1707_vm4, %v1653_v52  ;;  %v1654_v57 = vmax.f32 %v1590_v53, 0.0  ;;  %v701_v60 = vmul.f32 %v2007_v56, %v2532_v19  ;;  %v473_v61 = vpop.f32.mrb[13].mxu0  ;;  %v2081_v6 = vpop.f32.mrb[20].mxu1 }
 0x103   :  { %1716 = vst.msk [vmem:[%s3041_s8 + $0x40] sm:$0xff] %vm1707_vm4, %v1651_v54  ;;  %v1652_v62 = vmax.f32 %v1588_v55, 0.0  ;;  %v699_v1 = vmul.f32 %v2532_v19, %v473_v61  ;;  %v2008_v2 = vpop.f32.mrb[14].mxu0  ;;  %v1262_v9 = vpop.f32.mrb[21].mxu1  ;;  %v1466_v49 = vmul.f32 %v2081_v6, %v2520_v12 }
 0x104   :  { %1719 = vst.msk [vmem:[%s3041_s8 + $0x58] sm:$0xff] %vm1707_vm4, %v1654_v57  ;;  %v772_v3 = vadd.f32 %v2537_v22, %v701_v60  ;;  %v702_v4 = vmul.f32 %v2008_v2, %v2532_v19  ;;  %v476_v5 = vpop.f32.mrb[15].mxu0  ;;  %v2082_v15 = vpop.f32.mrb[22].mxu1  ;;  %v1464_v54 = vmul.f32 %v2520_v12, %v1262_v9 }
 0x105   :  { %1717 = vst.msk [vmem:[%s3041_s8 + $0x48] sm:$0xff] %vm1707_vm4, %v1652_v62  ;;  %v770_v7 = vadd.f32 %v2537_v22, %v699_v1  ;;  %v700_v8 = vmul.f32 %v2532_v19, %v476_v5  ;;  %v1265_v23 = vpop.f32.mrb[23].mxu1  ;;  %v1537_v62 = vadd.f32 %v2526_v17, %v1466_v49 }
 0x106   :  { %v1593_v11 = vadd.f32 %v1529_v58, %v772_v3  ;;  %v773_v13 = vadd.f32 %v2537_v22, %v702_v4  ;;  %v1535_v3 = vadd.f32 %v2526_v17, %v1464_v54  ;;  %v1465_v4 = vmul.f32 %v2520_v12, %v1265_v23 }
 0x107   :  { %v1591_v18 = vadd.f32 %v1527_v63, %v770_v7  ;;  %v771_v20 = vadd.f32 %v2537_v22, %v700_v8  ;;  %v1467_v63 = vmul.f32 %v2082_v15, %v2520_v12 }
 0x108   :  { %v1657_v24 = vmax.f32 %v1593_v11, 0.0  ;;  %v1594_v25 = vadd.f32 %v1530_v10, %v773_v13  ;;  %v1536_v23 = vadd.f32 %v2526_v17, %v1465_v4 }
 0x109   :  { %v1655_v26 = vmax.f32 %v1591_v18, 0.0  ;;  %v1592_v27 = vadd.f32 %v1528_v16, %v771_v20  ;;  %v2011_v28 = vpop.f32.mrb[16].mxu0  ;;  %v1538_v15 = vadd.f32 %v2526_v17, %v1467_v63 }
 0x10a   :  { %1722 = vst.msk [vmem:[%s3041_s8 + $0x70] sm:$0xff] %vm1707_vm4, %v1657_v24  ;;  %v1658_v29 = vmax.f32 %v1594_v25, 0.0  ;;  %v705_v32 = vmul.f32 %v2011_v28, %v2532_v19  ;;  %v489_v33 = vpop.f32.mrb[17].mxu0  ;;  %v2085_v42 = vpop.f32.mrb[24].mxu1 }
 0x10b   :  { %1720 = vst.msk [vmem:[%s3041_s8 + $0x60] sm:$0xff] %vm1707_vm4, %v1655_v26  ;;  %v1656_v34 = vmax.f32 %v1592_v27, 0.0  ;;  %v703_v37 = vmul.f32 %v2532_v19, %v489_v33  ;;  %v2012_v38 = vpop.f32.mrb[18].mxu0  ;;  %v1278_v45 = vpop.f32.mrb[25].mxu1  ;;  %v1470_v20 = vmul.f32 %v2085_v42, %v2520_v12 }
 0x10c   :  { %1723 = vst.msk [vmem:[%s3041_s8 + $0x78] sm:$0xff] %vm1707_vm4, %v1658_v29  ;;  %v776_v39 = vadd.f32 %v2537_v22, %v705_v32  ;;  %v706_v40 = vmul.f32 %v2012_v38, %v2532_v19  ;;  %v492_v41 = vpop.f32.mrb[19].mxu0  ;;  %v2086_v50 = vpop.f32.mrb[26].mxu1  ;;  %v1468_v26 = vmul.f32 %v2520_v12, %v1278_v45 }
 0x10d   :  { %1721 = vst.msk [vmem:[%s3041_s8 + $0x68] sm:$0xff] %vm1707_vm4, %v1656_v34  ;;  %v774_v43 = vadd.f32 %v2537_v22, %v703_v37  ;;  %v704_v44 = vmul.f32 %v2532_v19, %v492_v41  ;;  %v1281_v55 = vpop.f32.mrb[27].mxu1  ;;  %v1541_v34 = vadd.f32 %v2526_v17, %v1470_v20 }
 0x10e   :  { %v1597_v47 = vadd.f32 %v1533_v30, %v776_v39  ;;  %v777_v48 = vadd.f32 %v2537_v22, %v706_v40  ;;  %v1539_v39 = vadd.f32 %v2526_v17, %v1468_v26  ;;  %v1469_v40 = vmul.f32 %v2520_v12, %v1281_v55 }
 0x10f   :  { %v1595_v52 = vadd.f32 %v1531_v35, %v774_v43  ;;  %v775_v53 = vadd.f32 %v2537_v22, %v704_v44  ;;  %v1471_v35 = vmul.f32 %v2086_v50, %v2520_v12 }
 0x110   :  { %v1661_v56 = vmax.f32 %v1597_v47, 0.0  ;;  %v1598_v57 = vadd.f32 %v1534_v46, %v777_v48  ;;  %v1540_v55 = vadd.f32 %v2526_v17, %v1469_v40 }
 0x111   :  { %v1659_v58 = vmax.f32 %v1595_v52, 0.0  ;;  %v1596_v59 = vadd.f32 %v1532_v51, %v775_v53  ;;  %v2015_v60 = vpop.f32.mrb[20].mxu0  ;;  %v1542_v50 = vadd.f32 %v2526_v17, %v1471_v35 }
 0x112   :  { %1726 = vst.msk [vmem:[%s3041_s8 + $0x90] sm:$0xff] %vm1707_vm4, %v1661_v56  ;;  %v1662_v61 = vmax.f32 %v1598_v57, 0.0  ;;  %v709_v0 = vmul.f32 %v2015_v60, %v2532_v19  ;;  %v505_v1 = vpop.f32.mrb[21].mxu0  ;;  %v2089_v10 = vpop.f32.mrb[28].mxu1 }
 0x113   :  { %1724 = vst.msk [vmem:[%s3041_s8 + $0x80] sm:$0xff] %vm1707_vm4, %v1659_v58  ;;  %v1660_v2 = vmax.f32 %v1596_v59, 0.0  ;;  %v707_v5 = vmul.f32 %v2532_v19, %v505_v1  ;;  %v2016_v6 = vpop.f32.mrb[22].mxu0  ;;  %v1294_v14 = vpop.f32.mrb[29].mxu1  ;;  %v1474_v53 = vmul.f32 %v2089_v10, %v2520_v12 }
 0x114   :  { %1727 = vst.msk [vmem:[%s3041_s8 + $0x98] sm:$0xff] %vm1707_vm4, %v1662_v61  ;;  %v780_v7 = vadd.f32 %v2537_v22, %v709_v0  ;;  %v710_v8 = vmul.f32 %v2016_v6, %v2532_v19  ;;  %v508_v9 = vpop.f32.mrb[23].mxu0  ;;  %v2090_v21 = vpop.f32.mrb[30].mxu1  ;;  %v1472_v58 = vmul.f32 %v2520_v12, %v1294_v14 }
 0x115   :  { %1725 = vst.msk [vmem:[%s3041_s8 + $0x88] sm:$0xff] %vm1707_vm4, %v1660_v2  ;;  %v778_v11 = vadd.f32 %v2537_v22, %v707_v5  ;;  %v708_v13 = vmul.f32 %v2532_v19, %v508_v9  ;;  %v1297_v27 = vpop.f32.mrb[31].mxu1  ;;  %v1545_v2 = vadd.f32 %v2526_v17, %v1474_v53 }
 0x116   :  { %v1601_v16 = vadd.f32 %v1537_v62, %v780_v7  ;;  %v781_v18 = vadd.f32 %v2537_v22, %v710_v8  ;;  %v1543_v7 = vadd.f32 %v2526_v17, %v1472_v58  ;;  %v1473_v8 = vmul.f32 %v2520_v12, %v1297_v27 }
 0x117   :  { %v1599_v24 = vadd.f32 %v1535_v3, %v778_v11  ;;  %v779_v25 = vadd.f32 %v2537_v22, %v708_v13  ;;  %v1475_v3 = vmul.f32 %v2090_v21, %v2520_v12 }
 0x118   :  { %v1665_v28 = vmax.f32 %v1601_v16, 0.0  ;;  %v1602_v29 = vadd.f32 %v1538_v15, %v781_v18  ;;  %v1544_v27 = vadd.f32 %v2526_v17, %v1473_v8 }
 0x119   :  { %v1663_v30 = vmax.f32 %v1599_v24, 0.0  ;;  %v1600_v31 = vadd.f32 %v1536_v23, %v779_v25  ;;  %v2019_v32 = vpop.f32.mrb[24].mxu0  ;;  %v1546_v21 = vadd.f32 %v2526_v17, %v1475_v3 }
 0x11a   :  { %1730 = vst.msk [vmem:[%s3041_s8 + $0xb0] sm:$0xff] %vm1707_vm4, %v1665_v28  ;;  %v1666_v33 = vmax.f32 %v1602_v29, 0.0  ;;  %v713_v36 = vmul.f32 %v2019_v32, %v2532_v19  ;;  %v521_v37 = vpop.f32.mrb[25].mxu0  ;;  %v2093_v46 = vpop.f32.mrb[32].mxu1 }
 0x11b   :  { %1728 = vst.msk [vmem:[%s3041_s8 + $0xa0] sm:$0xff] %vm1707_vm4, %v1663_v30  ;;  %v1664_v38 = vmax.f32 %v1600_v31, 0.0  ;;  %v711_v41 = vmul.f32 %v2532_v19, %v521_v37  ;;  %v2020_v42 = vpop.f32.mrb[26].mxu0  ;;  %v1310_v49 = vpop.f32.mrb[33].mxu1  ;;  %v1478_v25 = vmul.f32 %v2093_v46, %v2520_v12 }
 0x11c   :  { %1731 = vst.msk [vmem:[%s3041_s8 + $0xb8] sm:$0xff] %vm1707_vm4, %v1666_v33  ;;  %v784_v43 = vadd.f32 %v2537_v22, %v713_v36  ;;  %v714_v44 = vmul.f32 %v2020_v42, %v2532_v19  ;;  %v524_v45 = vpop.f32.mrb[27].mxu0  ;;  %v2094_v54 = vpop.f32.mrb[34].mxu1  ;;  %v1476_v30 = vmul.f32 %v2520_v12, %v1310_v49 }
 0x11d   :  { %1729 = vst.msk [vmem:[%s3041_s8 + $0xa8] sm:$0xff] %vm1707_vm4, %v1664_v38  ;;  %v782_v47 = vadd.f32 %v2537_v22, %v711_v41  ;;  %v712_v48 = vmul.f32 %v2532_v19, %v524_v45  ;;  %v1313_v59 = vpop.f32.mrb[35].mxu1  ;;  %v1549_v38 = vadd.f32 %v2526_v17, %v1478_v25 }
 0x11e   :  { %v1605_v51 = vadd.f32 %v1541_v34, %v784_v43  ;;  %v785_v52 = vadd.f32 %v2537_v22, %v714_v44  ;;  %v1547_v43 = vadd.f32 %v2526_v17, %v1476_v30  ;;  %v1477_v44 = vmul.f32 %v2520_v12, %v1313_v59 }
 0x11f   :  { %v1603_v56 = vadd.f32 %v1539_v39, %v782_v47  ;;  %v783_v57 = vadd.f32 %v2537_v22, %v712_v48  ;;  %v1479_v39 = vmul.f32 %v2094_v54, %v2520_v12 }
 0x120   :  { %v1669_v60 = vmax.f32 %v1605_v51, 0.0  ;;  %v1606_v61 = vadd.f32 %v1542_v50, %v785_v52  ;;  %v1548_v59 = vadd.f32 %v2526_v17, %v1477_v44 }
 0x121   :  { %v1667_v62 = vmax.f32 %v1603_v56, 0.0  ;;  %v1604_v63 = vadd.f32 %v1540_v55, %v783_v57  ;;  %v2023_v0 = vpop.f32.mrb[28].mxu0  ;;  %v1550_v54 = vadd.f32 %v2526_v17, %v1479_v39 }
 0x122   :  { %1734 = vst.msk [vmem:[%s3041_s8 + $0xd0] sm:$0xff] %vm1707_vm4, %v1669_v60  ;;  %v1670_v1 = vmax.f32 %v1606_v61, 0.0  ;;  %v717_v4 = vmul.f32 %v2023_v0, %v2532_v19  ;;  %v537_v5 = vpop.f32.mrb[29].mxu0  ;;  %v2097_v15 = vpop.f32.mrb[36].mxu1 }
 0x123   :  { %1732 = vst.msk [vmem:[%s3041_s8 + $0xc0] sm:$0xff] %vm1707_vm4, %v1667_v62  ;;  %v1668_v6 = vmax.f32 %v1604_v63, 0.0  ;;  %v715_v9 = vmul.f32 %v2532_v19, %v537_v5  ;;  %v2024_v10 = vpop.f32.mrb[30].mxu0  ;;  %v1326_v20 = vpop.f32.mrb[37].mxu1  ;;  %v1482_v57 = vmul.f32 %v2097_v15, %v2520_v12 }
 0x124   :  { %1735 = vst.msk [vmem:[%s3041_s8 + $0xd8] sm:$0xff] %vm1707_vm4, %v1670_v1  ;;  %v788_v11 = vadd.f32 %v2537_v22, %v717_v4  ;;  %v718_v13 = vmul.f32 %v2024_v10, %v2532_v19  ;;  %v540_v14 = vpop.f32.mrb[31].mxu0  ;;  %v2098_v26 = vpop.f32.mrb[38].mxu1  ;;  %v1480_v62 = vmul.f32 %v2520_v12, %v1326_v20 }
 0x125   :  { %1733 = vst.msk [vmem:[%s3041_s8 + $0xc8] sm:$0xff] %vm1707_vm4, %v1668_v6  ;;  %v786_v16 = vadd.f32 %v2537_v22, %v715_v9  ;;  %v716_v18 = vmul.f32 %v2532_v19, %v540_v14  ;;  %v1329_v31 = vpop.f32.mrb[39].mxu1  ;;  %v1553_v6 = vadd.f32 %v2526_v17, %v1482_v57 }
 0x126   :  { %v1609_v23 = vadd.f32 %v1545_v2, %v788_v11  ;;  %v789_v24 = vadd.f32 %v2537_v22, %v718_v13  ;;  %v1551_v11 = vadd.f32 %v2526_v17, %v1480_v62  ;;  %v1481_v13 = vmul.f32 %v2520_v12, %v1329_v31 }
 0x127   :  { %v1607_v28 = vadd.f32 %v1543_v7, %v786_v16  ;;  %v787_v29 = vadd.f32 %v2537_v22, %v716_v18  ;;  %v1483_v7 = vmul.f32 %v2098_v26, %v2520_v12 }
 0x128   :  { %v1673_v32 = vmax.f32 %v1609_v23, 0.0  ;;  %v1610_v33 = vadd.f32 %v1546_v21, %v789_v24  ;;  %v1552_v31 = vadd.f32 %v2526_v17, %v1481_v13 }
 0x129   :  { %v1671_v34 = vmax.f32 %v1607_v28, 0.0  ;;  %v1608_v35 = vadd.f32 %v1544_v27, %v787_v29  ;;  %v2027_v36 = vpop.f32.mrb[32].mxu0  ;;  %v1554_v26 = vadd.f32 %v2526_v17, %v1483_v7 }
 0x12a   :  { %1738 = vst.msk [vmem:[%s3041_s8 + $0xf0] sm:$0xff] %vm1707_vm4, %v1673_v32  ;;  %v1674_v37 = vmax.f32 %v1610_v33, 0.0  ;;  %v721_v40 = vmul.f32 %v2027_v36, %v2532_v19  ;;  %v553_v41 = vpop.f32.mrb[33].mxu0  ;;  %v2101_v50 = vpop.f32.mrb[40].mxu1 }
 0x12b   :  { %1736 = vst.msk [vmem:[%s3041_s8 + $0xe0] sm:$0xff] %vm1707_vm4, %v1671_v34  ;;  %v1672_v42 = vmax.f32 %v1608_v35, 0.0  ;;  %v719_v45 = vmul.f32 %v2532_v19, %v553_v41  ;;  %v2028_v46 = vpop.f32.mrb[34].mxu0  ;;  %v1342_v53 = vpop.f32.mrb[41].mxu1  ;;  %v1486_v29 = vmul.f32 %v2101_v50, %v2520_v12 }
 0x12c   :  { %1739 = vst.msk [vmem:[%s3041_s8 + $0xf8] sm:$0xff] %vm1707_vm4, %v1674_v37  ;;  %v792_v47 = vadd.f32 %v2537_v22, %v721_v40  ;;  %v722_v48 = vmul.f32 %v2028_v46, %v2532_v19  ;;  %v556_v49 = vpop.f32.mrb[35].mxu0  ;;  %v2102_v58 = vpop.f32.mrb[42].mxu1  ;;  %v1484_v34 = vmul.f32 %v2520_v12, %v1342_v53 }
 0x12d   :  { %1737 = vst.msk [vmem:[%s3041_s8 + $0xe8] sm:$0xff] %vm1707_vm4, %v1672_v42  ;;  %v790_v51 = vadd.f32 %v2537_v22, %v719_v45  ;;  %v720_v52 = vmul.f32 %v2532_v19, %v556_v49  ;;  %v1345_v63 = vpop.f32.mrb[43].mxu1  ;;  %v1557_v42 = vadd.f32 %v2526_v17, %v1486_v29 }
 0x12e   :  { %v1613_v55 = vadd.f32 %v1549_v38, %v792_v47  ;;  %v793_v56 = vadd.f32 %v2537_v22, %v722_v48  ;;  %v1555_v47 = vadd.f32 %v2526_v17, %v1484_v34  ;;  %v1485_v48 = vmul.f32 %v2520_v12, %v1345_v63 }
 0x12f   :  { %v1611_v60 = vadd.f32 %v1547_v43, %v790_v51  ;;  %v791_v61 = vadd.f32 %v2537_v22, %v720_v52  ;;  %v1487_v43 = vmul.f32 %v2102_v58, %v2520_v12 }
 0x130   :  { %v1677_v0 = vmax.f32 %v1613_v55, 0.0  ;;  %v1614_v1 = vadd.f32 %v1550_v54, %v793_v56  ;;  %v1556_v63 = vadd.f32 %v2526_v17, %v1485_v48 }
 0x131   :  { %v1675_v2 = vmax.f32 %v1611_v60, 0.0  ;;  %v1612_v3 = vadd.f32 %v1548_v59, %v791_v61  ;;  %v2031_v4 = vpop.f32.mrb[36].mxu0  ;;  %v1558_v58 = vadd.f32 %v2526_v17, %v1487_v43 }
 0x132   :  { %1742 = vst.msk [vmem:[%s3041_s8 + $0x110] sm:$0xff] %vm1707_vm4, %v1677_v0  ;;  %v1678_v5 = vmax.f32 %v1614_v1, 0.0  ;;  %v725_v8 = vmul.f32 %v2031_v4, %v2532_v19  ;;  %v569_v9 = vpop.f32.mrb[37].mxu0  ;;  %v2105_v21 = vpop.f32.mrb[44].mxu1 }
 0x133   :  { %1740 = vst.msk [vmem:[%s3041_s8 + $0x100] sm:$0xff] %vm1707_vm4, %v1675_v2  ;;  %v1676_v10 = vmax.f32 %v1612_v3, 0.0  ;;  %v723_v14 = vmul.f32 %v2532_v19, %v569_v9  ;;  %v2032_v15 = vpop.f32.mrb[38].mxu0  ;;  %v1358_v25 = vpop.f32.mrb[45].mxu1  ;;  %v1490_v61 = vmul.f32 %v2105_v21, %v2520_v12 }
 0x134   :  { %1743 = vst.msk [vmem:[%s3041_s8 + $0x118] sm:$0xff] %vm1707_vm4, %v1678_v5  ;;  %v796_v16 = vadd.f32 %v2537_v22, %v725_v8  ;;  %v726_v18 = vmul.f32 %v2032_v15, %v2532_v19  ;;  %v572_v20 = vpop.f32.mrb[39].mxu0  ;;  %v2106_v30 = vpop.f32.mrb[46].mxu1  ;;  %v1488_v2 = vmul.f32 %v2520_v12, %v1358_v25 }
 0x135   :  { %1741 = vst.msk [vmem:[%s3041_s8 + $0x108] sm:$0xff] %vm1707_vm4, %v1676_v10  ;;  %v794_v23 = vadd.f32 %v2537_v22, %v723_v14  ;;  %v724_v24 = vmul.f32 %v2532_v19, %v572_v20  ;;  %v1361_v35 = vpop.f32.mrb[47].mxu1  ;;  %v1561_v10 = vadd.f32 %v2526_v17, %v1490_v61 }
 0x136   :  { %v1617_v27 = vadd.f32 %v1553_v6, %v796_v16  ;;  %v797_v28 = vadd.f32 %v2537_v22, %v726_v18  ;;  %v1559_v16 = vadd.f32 %v2526_v17, %v1488_v2  ;;  %v1489_v18 = vmul.f32 %v2520_v12, %v1361_v35 }
 0x137   :  { %v1615_v32 = vadd.f32 %v1551_v11, %v794_v23  ;;  %v795_v33 = vadd.f32 %v2537_v22, %v724_v24  ;;  %v1491_v11 = vmul.f32 %v2106_v30, %v2520_v12 }
 0x138   :  { %v1681_v36 = vmax.f32 %v1617_v27, 0.0  ;;  %v1618_v37 = vadd.f32 %v1554_v26, %v797_v28  ;;  %v1560_v35 = vadd.f32 %v2526_v17, %v1489_v18 }
 0x139   :  { %v1679_v38 = vmax.f32 %v1615_v32, 0.0  ;;  %v1616_v39 = vadd.f32 %v1552_v31, %v795_v33  ;;  %v2035_v40 = vpop.f32.mrb[40].mxu0  ;;  %v1562_v30 = vadd.f32 %v2526_v17, %v1491_v11 }
 0x13a   :  { %1746 = vst.msk [vmem:[%s3041_s8 + $0x130] sm:$0xff] %vm1707_vm4, %v1681_v36  ;;  %v1682_v41 = vmax.f32 %v1618_v37, 0.0  ;;  %v729_v44 = vmul.f32 %v2035_v40, %v2532_v19  ;;  %v585_v45 = vpop.f32.mrb[41].mxu0  ;;  %v2109_v54 = vpop.f32.mrb[48].mxu1 }
 0x13b   :  { %1744 = vst.msk [vmem:[%s3041_s8 + $0x120] sm:$0xff] %vm1707_vm4, %v1679_v38  ;;  %v1680_v46 = vmax.f32 %v1616_v39, 0.0  ;;  %v727_v49 = vmul.f32 %v2532_v19, %v585_v45  ;;  %v2036_v50 = vpop.f32.mrb[42].mxu0  ;;  %v1374_v57 = vpop.f32.mrb[49].mxu1  ;;  %v1494_v33 = vmul.f32 %v2109_v54, %v2520_v12 }
 0x13c   :  { %1747 = vst.msk [vmem:[%s3041_s8 + $0x138] sm:$0xff] %vm1707_vm4, %v1682_v41  ;;  %v800_v51 = vadd.f32 %v2537_v22, %v729_v44  ;;  %v730_v52 = vmul.f32 %v2036_v50, %v2532_v19  ;;  %v588_v53 = vpop.f32.mrb[43].mxu0  ;;  %v2110_v62 = vpop.f32.mrb[50].mxu1  ;;  %v1492_v38 = vmul.f32 %v2520_v12, %v1374_v57 }
 0x13d   :  { %1745 = vst.msk [vmem:[%s3041_s8 + $0x128] sm:$0xff] %vm1707_vm4, %v1680_v46  ;;  %v798_v55 = vadd.f32 %v2537_v22, %v727_v49  ;;  %v728_v56 = vmul.f32 %v2532_v19, %v588_v53  ;;  %v1377_v3 = vpop.f32.mrb[51].mxu1  ;;  %v1565_v46 = vadd.f32 %v2526_v17, %v1494_v33 }
 0x13e   :  { %v1621_v59 = vadd.f32 %v1557_v42, %v800_v51  ;;  %v801_v60 = vadd.f32 %v2537_v22, %v730_v52  ;;  %v1563_v51 = vadd.f32 %v2526_v17, %v1492_v38  ;;  %v1493_v52 = vmul.f32 %v2520_v12, %v1377_v3 }
 0x13f   :  { %v1619_v0 = vadd.f32 %v1555_v47, %v798_v55  ;;  %v799_v1 = vadd.f32 %v2537_v22, %v728_v56  ;;  %v1495_v47 = vmul.f32 %v2110_v62, %v2520_v12 }
 0x140   :  { %v1685_v4 = vmax.f32 %v1621_v59, 0.0  ;;  %v1622_v5 = vadd.f32 %v1558_v58, %v801_v60  ;;  %v1564_v3 = vadd.f32 %v2526_v17, %v1493_v52 }
 0x141   :  { %v1683_v6 = vmax.f32 %v1619_v0, 0.0  ;;  %v1620_v7 = vadd.f32 %v1556_v63, %v799_v1  ;;  %v2039_v8 = vpop.f32.mrb[44].mxu0  ;;  %v1566_v62 = vadd.f32 %v2526_v17, %v1495_v47 }
 0x142   :  { %1750 = vst.msk [vmem:[%s3041_s8 + $0x150] sm:$0xff] %vm1707_vm4, %v1685_v4  ;;  %v1686_v9 = vmax.f32 %v1622_v5, 0.0  ;;  %v733_v13 = vmul.f32 %v2039_v8, %v2532_v19  ;;  %v601_v14 = vpop.f32.mrb[45].mxu0  ;;  %v2113_v26 = vpop.f32.mrb[52].mxu1 }
 0x143   :  { %1748 = vst.msk [vmem:[%s3041_s8 + $0x140] sm:$0xff] %vm1707_vm4, %v1683_v6  ;;  %v1684_v15 = vmax.f32 %v1620_v7, 0.0  ;;  %v731_v20 = vmul.f32 %v2532_v19, %v601_v14  ;;  %v2040_v21 = vpop.f32.mrb[46].mxu0  ;;  %v1390_v29 = vpop.f32.mrb[53].mxu1  ;;  %v1498_v1 = vmul.f32 %v2113_v26, %v2520_v12 }
 0x144   :  { %1751 = vst.msk [vmem:[%s3041_s8 + $0x158] sm:$0xff] %vm1707_vm4, %v1686_v9  ;;  %v804_v23 = vadd.f32 %v2537_v22, %v733_v13  ;;  %v734_v24 = vmul.f32 %v2040_v21, %v2532_v19  ;;  %v604_v25 = vpop.f32.mrb[47].mxu0  ;;  %v2114_v34 = vpop.f32.mrb[54].mxu1  ;;  %v1496_v6 = vmul.f32 %v2520_v12, %v1390_v29 }
 0x145   :  { %1749 = vst.msk [vmem:[%s3041_s8 + $0x148] sm:$0xff] %vm1707_vm4, %v1684_v15  ;;  %v802_v27 = vadd.f32 %v2537_v22, %v731_v20  ;;  %v732_v28 = vmul.f32 %v2532_v19, %v604_v25  ;;  %v1393_v39 = vpop.f32.mrb[55].mxu1  ;;  %v1569_v15 = vadd.f32 %v2526_v17, %v1498_v1 }
 0x146   :  { %v1625_v31 = vadd.f32 %v1561_v10, %v804_v23  ;;  %v805_v32 = vadd.f32 %v2537_v22, %v734_v24  ;;  %v1567_v23 = vadd.f32 %v2526_v17, %v1496_v6  ;;  %v1497_v24 = vmul.f32 %v2520_v12, %v1393_v39 }
 0x147   :  { %v1623_v36 = vadd.f32 %v1559_v16, %v802_v27  ;;  %v803_v37 = vadd.f32 %v2537_v22, %v732_v28  ;;  %v1499_v16 = vmul.f32 %v2114_v34, %v2520_v12 }
 0x148   :  { %v1689_v40 = vmax.f32 %v1625_v31, 0.0  ;;  %v1626_v41 = vadd.f32 %v1562_v30, %v805_v32  ;;  %v1568_v39 = vadd.f32 %v2526_v17, %v1497_v24 }
 0x149   :  { %v1687_v42 = vmax.f32 %v1623_v36, 0.0  ;;  %v1624_v43 = vadd.f32 %v1560_v35, %v803_v37  ;;  %v2043_v44 = vpop.f32.mrb[48].mxu0  ;;  %v1570_v34 = vadd.f32 %v2526_v17, %v1499_v16 }
 0x14a   :  { %1754 = vst.msk [vmem:[%s3041_s8 + $0x170] sm:$0xff] %vm1707_vm4, %v1689_v40  ;;  %v1690_v45 = vmax.f32 %v1626_v41, 0.0  ;;  %v737_v48 = vmul.f32 %v2043_v44, %v2532_v19  ;;  %v617_v49 = vpop.f32.mrb[49].mxu0  ;;  %v2117_v58 = vpop.f32.mrb[56].mxu1 }
 0x14b   :  { %1752 = vst.msk [vmem:[%s3041_s8 + $0x160] sm:$0xff] %vm1707_vm4, %v1687_v42  ;;  %v1688_v50 = vmax.f32 %v1624_v43, 0.0  ;;  %v735_v53 = vmul.f32 %v2532_v19, %v617_v49  ;;  %v2044_v54 = vpop.f32.mrb[50].mxu0  ;;  %v1406_v61 = vpop.f32.mrb[57].mxu1  ;;  %v1502_v37 = vmul.f32 %v2117_v58, %v2520_v12 }
 0x14c   :  { %1755 = vst.msk [vmem:[%s3041_s8 + $0x178] sm:$0xff] %vm1707_vm4, %v1690_v45  ;;  %v808_v55 = vadd.f32 %v2537_v22, %v737_v48  ;;  %v738_v56 = vmul.f32 %v2044_v54, %v2532_v19  ;;  %v620_v57 = vpop.f32.mrb[51].mxu0  ;;  %v2118_v2 = vpop.f32.mrb[58].mxu1  ;;  %v1500_v42 = vmul.f32 %v2520_v12, %v1406_v61  ;;  %v2195_v54 = vld [vmem:[%s3038_s7] ss:$0 sm:$0xff] }
 0x14d   :  { %1753 = vst.msk [vmem:[%s3041_s8 + $0x168] sm:$0xff] %vm1707_vm4, %v1688_v50  ;;  %v806_v59 = vadd.f32 %v2537_v22, %v735_v53  ;;  %v736_v60 = vmul.f32 %v2532_v19, %v620_v57  ;;  %v1409_v7 = vpop.f32.mrb[59].mxu1  ;;  %v1573_v50 = vadd.f32 %v2526_v17, %v1502_v37 }
 0x14e   :  { %v1629_v63 = vadd.f32 %v1565_v46, %v808_v55  ;;  %v809_v0 = vadd.f32 %v2537_v22, %v738_v56  ;;  %v1571_v55 = vadd.f32 %v2195_v54, %v1500_v42  ;;  %v2196_v56 = vld [vmem:[%s3039_s3] ss:$0 sm:$0xff] }
 0x14f   :  { %v1627_v4 = vadd.f32 %v1563_v51, %v806_v59  ;;  %v807_v5 = vadd.f32 %v2537_v22, %v736_v60 }
 0x150   :  { %v1693_v8 = vmax.f32 %v1629_v63, 0.0  ;;  %v1630_v9 = vadd.f32 %v1566_v62, %v809_v0 }
 0x151   :  { %v1691_v10 = vmax.f32 %v1627_v4, 0.0  ;;  %v1628_v11 = vadd.f32 %v1564_v3, %v807_v5  ;;  %v2047_v13 = vpop.f32.mrb[52].mxu0 }
 0x152   :  { %1758 = vst.msk [vmem:[%s3041_s8 + $0x190] sm:$0xff] %vm1707_vm4, %v1693_v8  ;;  %v1694_v14 = vmax.f32 %v1630_v9, 0.0  ;;  %v741_v18 = vmul.f32 %v2047_v13, %v2532_v19  ;;  %v633_v20 = vpop.f32.mrb[53].mxu0  ;;  %v2121_v30 = vpop.f32.mrb[60].mxu1 }
 0x153   :  { %1756 = vst.msk [vmem:[%s3041_s8 + $0x180] sm:$0xff] %vm1707_vm4, %v1691_v10  ;;  %v1692_v21 = vmax.f32 %v1628_v11, 0.0  ;;  %v739_v25 = vmul.f32 %v2532_v19, %v633_v20  ;;  %v2048_v26 = vpop.f32.mrb[54].mxu0  ;;  %v1422_v33 = vpop.f32.mrb[61].mxu1 }
 0x154   :  { %1759 = vst.msk [vmem:[%s3041_s8 + $0x198] sm:$0xff] %vm1707_vm4, %v1694_v14  ;;  %v812_v27 = vadd.f32 %v2537_v22, %v741_v18  ;;  %v742_v28 = vmul.f32 %v2048_v26, %v2532_v19  ;;  %v636_v29 = vpop.f32.mrb[55].mxu0  ;;  %v2122_v38 = vpop.f32.mrb[62].mxu1 }
 0x155   :  { %1757 = vst.msk [vmem:[%s3041_s8 + $0x188] sm:$0xff] %vm1707_vm4, %v1692_v21  ;;  %v810_v31 = vadd.f32 %v2537_v22, %v739_v25  ;;  %v740_v32 = vmul.f32 %v2532_v19, %v636_v29  ;;  %v1425_v43 = vpop.f32.mrb[63].mxu1 }
 0x156   :  { %v1633_v35 = vadd.f32 %v1569_v15, %v812_v27  ;;  %v813_v36 = vadd.f32 %v2537_v22, %v742_v28 }
 0x157   :  { %v1631_v40 = vadd.f32 %v1567_v23, %v810_v31  ;;  %v811_v41 = vadd.f32 %v2537_v22, %v740_v32  ;;  %v2194_v22 = vld [vmem:[%s3037_s6] ss:$0 sm:$0xff] }
 0x158   :  { %v1697_v44 = vmax.f32 %v1633_v35, 0.0  ;;  %v1634_v45 = vadd.f32 %v1570_v34, %v813_v36  ;;  %v1503_v51 = vmul.f32 %v2194_v22, %v2118_v2  ;;  %v1501_v17 = vmul.f32 %v2194_v22, %v1409_v7 }
 0x159   :  { %v1695_v46 = vmax.f32 %v1631_v40, 0.0  ;;  %v1632_v47 = vadd.f32 %v1568_v39, %v811_v41  ;;  %v2051_v48 = vpop.f32.mrb[56].mxu0  ;;  %v1506_v3 = vmul.f32 %v2194_v22, %v2121_v30  ;;  %v1504_v7 = vmul.f32 %v2194_v22, %v1422_v33 }
 0x15a   :  { %1762 = vst.msk [vmem:[%s3041_s8 + $0x1b0] sm:$0xff] %vm1707_vm4, %v1697_v44  ;;  %v1698_v49 = vmax.f32 %v1634_v45, 0.0  ;;  %v745_v12 = vmul.f32 %v2051_v48, %v2532_v19  ;;  %v649_v52 = vpop.f32.mrb[57].mxu0  ;;  %v2197_v19 = vld [vmem:[%s3040_s4] ss:$0 sm:$0xff]  ;;  %v1574_v0 = vadd.f32 %v2195_v54, %v1503_v51  ;;  %v1572_v4 = vadd.f32 %v2195_v54, %v1501_v17 }
 0x15b   :  { %1760 = vst.msk [vmem:[%s3041_s8 + $0x1a0] sm:$0xff] %vm1707_vm4, %v1695_v46  ;;  %v1696_v53 = vmax.f32 %v1632_v47, 0.0  ;;  %v743_v57 = vmul.f32 %v2196_v56, %v649_v52  ;;  %v2052_v58 = vpop.f32.mrb[58].mxu0  ;;  %v1577_v15 = vadd.f32 %v2195_v54, %v1506_v3  ;;  %v1507_v16 = vmul.f32 %v2194_v22, %v2122_v38 }
 0x15c   :  { %1763 = vst.msk [vmem:[%s3041_s8 + $0x1b8] sm:$0xff] %vm1707_vm4, %v1698_v49  ;;  %v816_v59 = vadd.f32 %v2197_v19, %v745_v12  ;;  %v746_v60 = vmul.f32 %v2196_v56, %v2052_v58  ;;  %v652_v61 = vpop.f32.mrb[59].mxu0  ;;  %v1575_v23 = vadd.f32 %v2195_v54, %v1504_v7  ;;  %v1505_v24 = vmul.f32 %v2194_v22, %v1425_v43 }
 0x15d   :  { %1761 = vst.msk [vmem:[%s3041_s8 + $0x1a8] sm:$0xff] %vm1707_vm4, %v1696_v53  ;;  %v814_v62 = vadd.f32 %v2197_v19, %v743_v57  ;;  %v744_v63 = vmul.f32 %v2196_v56, %v652_v61  ;;  %v1578_v32 = vadd.f32 %v2195_v54, %v1507_v16 }
 0x15e   :  { %v1637_v1 = vadd.f32 %v1573_v50, %v816_v59  ;;  %v817_v2 = vadd.f32 %v2197_v19, %v746_v60  ;;  %v1576_v35 = vadd.f32 %v2195_v54, %v1505_v24 }
 0x15f   :  { %v1635_v5 = vadd.f32 %v1571_v55, %v814_v62  ;;  %v815_v6 = vadd.f32 %v2197_v19, %v744_v63 }
 0x160   :  { %v1701_v8 = vmax.f32 %v1637_v1, 0.0  ;;  %v1638_v9 = vadd.f32 %v1574_v0, %v817_v2 }
 0x161   :  { %v1699_v10 = vmax.f32 %v1635_v5, 0.0  ;;  %v1636_v11 = vadd.f32 %v1572_v4, %v815_v6  ;;  %v2055_v13 = vpop.f32.mrb[60].mxu0 }
 0x162   :  { %1766 = vst.msk [vmem:[%s3041_s8 + $0x1d0] sm:$0xff] %vm1707_vm4, %v1701_v8  ;;  %v1702_v14 = vmax.f32 %v1638_v9, 0.0  ;;  %v749_v18 = vmul.f32 %v2196_v56, %v2055_v13  ;;  %v665_v20 = vpop.f32.mrb[61].mxu0 }
 0x163   :  { %1764 = vst.msk [vmem:[%s3041_s8 + $0x1c0] sm:$0xff] %vm1707_vm4, %v1699_v10  ;;  %v1700_v21 = vmax.f32 %v1636_v11, 0.0  ;;  %v747_v25 = vmul.f32 %v2196_v56, %v665_v20  ;;  %v2056_v26 = vpop.f32.mrb[62].mxu0 }
 0x164   :  { %1767 = vst.msk [vmem:[%s3041_s8 + $0x1d8] sm:$0xff] %vm1707_vm4, %v1702_v14  ;;  %v820_v27 = vadd.f32 %v2197_v19, %v749_v18  ;;  %v750_v28 = vmul.f32 %v2196_v56, %v2056_v26  ;;  %v668_v29 = vpop.f32.mrb[63].mxu0 }
 0x165   :  { %1765 = vst.msk [vmem:[%s3041_s8 + $0x1c8] sm:$0xff] %vm1707_vm4, %v1700_v21  ;;  %v818_v30 = vadd.f32 %v2197_v19, %v747_v25  ;;  %v748_v31 = vmul.f32 %v2196_v56, %v668_v29 }
 0x166   :  { %v1641_v33 = vadd.f32 %v1577_v15, %v820_v27  ;;  %v821_v34 = vadd.f32 %v2197_v19, %v750_v28 }
 0x167   :  { %v1639_v36 = vadd.f32 %v1575_v23, %v818_v30  ;;  %v819_v37 = vadd.f32 %v2197_v19, %v748_v31 }
 0x168   :  { %v1705_v38 = vmax.f32 %v1641_v33, 0.0  ;;  %v1642_v39 = vadd.f32 %v1578_v32, %v821_v34 }
 0x169   :  { %v1703_v40 = vmax.f32 %v1639_v36, 0.0  ;;  %v1640_v41 = vadd.f32 %v1576_v35, %v819_v37 }
 0x16a   :  { %1770 = vst.msk [vmem:[%s3041_s8 + $0x1f0] sm:$0xff] %vm1707_vm4, %v1705_v38  ;;  %v1706_v42 = vmax.f32 %v1642_v39, 0.0 }
 0x16b   :  { %1768 = vst.msk [vmem:[%s3041_s8 + $0x1e0] sm:$0xff] %vm1707_vm4, %v1703_v40  ;;  %v1704_v43 = vmax.f32 %v1640_v41, 0.0 }
 0x16c   :  { %1771 = vst.msk [vmem:[%s3041_s8 + $0x1f8] sm:$0xff] %vm1707_vm4, %v1706_v42 }
 0x16d   :  { %1769 = vst.msk [vmem:[%s3041_s8 + $0x1e8] sm:$0xff] %vm1707_vm4, %v1704_v43 }

</bundles_post_ra>
